<compile_context>
chip_gen: v7x
topology: tpu7x:2x2x1
jax: 0.10.0
libtpu: 0.0.40
codegen_flags: <defaults>
</compile_context>

<pallas_src>
import functools

import jax
import jax.numpy as jnp
from jax.experimental import pallas as pl
from jax.experimental.pallas import tpu as pltpu


def _round_up(n, m):
    return ((n + m - 1) // m) * m


def _rnn_kernel(x_ref, wih_ref, whh_ref, b_ref, wfc_ref, bfc_ref, out_ref,
                buf, *, seq_len, batch, num_layers, d_pad, h_pad):
    """Single grid step: runs all layers + FC head.

    x_ref   : (T*Bp, d_pad)  time-major flattened, feature/batch-padded input
    wih_ref : (L, d_pad, h_pad)   W_ih^T per layer (zero-row/col padded)
    whh_ref : (L, h_pad, h_pad)   W_hh^T per layer
    b_ref   : (L, 1, h_pad)       b_ih + b_hh per layer
    wfc_ref : (h_pad, c_pad)      W_fc^T
    bfc_ref : (1, c_pad)
    out_ref : (Bp, c_pad)
    buf     : VMEM (T*Bp, h_pad) scratch; holds pre-activations, then the
              layer's hidden-state sequence (input to the next layer).
    """
    cdt = wih_ref.dtype  # dtype fed to the MXU (f32 default, bf16 optional)

    h = jnp.zeros((batch, h_pad), jnp.float32)
    for l in range(num_layers):
        # ---- hoisted input projection: one big GEMM + folded bias --------
        if l == 0:
            src = x_ref[...]                      # (T*Bp, d_pad)
            w_ih = wih_ref[0]                     # (d_pad, h_pad)
        else:
            src = buf[...]                        # (T*Bp, h_pad)
            w_ih = wih_ref[l]
            if d_pad > h_pad:                     # static slice (rarely hit)
                w_ih = w_ih[:h_pad, :]
        pre = (jnp.dot(src.astype(cdt), w_ih,
                       preferred_element_type=jnp.float32)
               + b_ref[l])                        # (T*Bp, h_pad)
        buf[...] = pre

        # ---- serial recurrence, fully unrolled ---------------------------
        w_hh = whh_ref[l]                         # (h_pad, h_pad)
        h = jnp.zeros((batch, h_pad), jnp.float32)
        last_layer = (l == num_layers - 1)
        for t in range(seq_len):
            row = pl.ds(t * batch, batch)         # static, sublane-aligned
            h = jnp.tanh(buf[row, :]
                         + jnp.dot(h.astype(cdt), w_hh,
                                   preferred_element_type=jnp.float32))
            if not last_layer:
                buf[row, :] = h                   # next layer's input at t

    # ---- FC head on the last timestep of the last layer -------------------
    out_ref[...] = (jnp.dot(h.astype(cdt), wfc_ref[...],
                            preferred_element_type=jnp.float32)
                    + bfc_ref[...])


def rnn_forward_pallas(x, params, *, hidden_size, num_layers, num_classes,
                       weight_dtype=jnp.float32):
    """x: (batch, seq, input_size) float32, batch_first like the PyTorch module.

    weight_dtype=jnp.bfloat16 enables the MXU fast path on v6e/v7x (relax the
    test tolerance if used); default f32 keeps exact parity on all chips.
    """
    w_ih_list, w_hh_list, b_ih_list, b_hh_list, w_fc, b_fc = params
    B, T, I = x.shape
    H, L, C = hidden_size, num_layers, num_classes
    LANE, SUB = 128, 8
    h_pad = _round_up(H, LANE)
    d_pad = max(_round_up(I, LANE), h_pad)
    c_pad = _round_up(C, LANE)
    b_pad = _round_up(B, SUB)

    # --- glue: pack / pad parameters, time-major flatten input (plain JAX) --
    x2d = jnp.transpose(x, (1, 0, 2))                            # (T, B, I)
    x2d = jnp.pad(x2d, ((0, 0), (0, b_pad - B), (0, d_pad - I)))
    x2d = x2d.reshape(T * b_pad, d_pad)                          # (T*Bp, d_pad)

    wih = []
    for l in range(L):
        w = jnp.transpose(w_ih_list[l])                          # (in_l, H)
        w = jnp.pad(w, ((0, d_pad - w.shape[0]), (0, h_pad - H)))
        wih.append(w)
    wih = jnp.stack(wih).astype(weight_dtype)                    # (L,d_pad,h_pad)
    whh = jnp.stack([
        jnp.pad(jnp.transpose(w), ((0, h_pad - H), (0, h_pad - H)))
        for w in w_hh_list]).astype(weight_dtype)                # (L,h_pad,h_pad)
    bias = jnp.stack([
        jnp.pad((b_ih_list[l] + b_hh_list[l]).reshape(1, H),     # folded bias
                ((0, 0), (0, h_pad - H)))
        for l in range(L)])                                      # (L,1,h_pad)
    wfc = jnp.pad(jnp.transpose(w_fc),
                  ((0, h_pad - H), (0, c_pad - C))).astype(weight_dtype)
    bfc = jnp.pad(b_fc.reshape(1, C), ((0, 0), (0, c_pad - C)))  # (1, c_pad)

    kernel = functools.partial(_rnn_kernel, seq_len=T, batch=b_pad,
                               num_layers=L, d_pad=d_pad, h_pad=h_pad)

    out = pl.pallas_call(
        kernel,
        out_shape=jax.ShapeDtypeStruct((b_pad, c_pad), jnp.float32),
        grid_spec=pltpu.PrefetchScalarGridSpec(
            num_scalar_prefetch=0,
            grid=(1,),
            in_specs=[
                pl.BlockSpec((T * b_pad, d_pad), lambda i: (0, 0)),    # x
                pl.BlockSpec((L, d_pad, h_pad), lambda i: (0, 0, 0)),  # W_ih^T
                pl.BlockSpec((L, h_pad, h_pad), lambda i: (0, 0, 0)),  # W_hh^T
                pl.BlockSpec((L, 1, h_pad), lambda i: (0, 0, 0)),      # b
                pl.BlockSpec((h_pad, c_pad), lambda i: (0, 0)),        # W_fc^T
                pl.BlockSpec((1, c_pad), lambda i: (0, 0)),            # b_fc
            ],
            out_specs=pl.BlockSpec((b_pad, c_pad), lambda i: (0, 0)),
            scratch_shapes=[pltpu.VMEM((T * b_pad, h_pad), jnp.float32)],
        ),
        compiler_params=pltpu.CompilerParams(
            dimension_semantics=("arbitrary",),
            vmem_limit_bytes=32 * 1024 * 1024,
        ),
    )(x2d, wih, whh, bias, wfc, bfc)
    return out[:B, :C]


def rnn_forward_ref(x, params, *, hidden_size, num_layers):
    """Pure-JAX reference matching torch.nn.RNN(batch_first=True) + Linear."""
    w_ih_list, w_hh_list, b_ih_list, b_hh_list, w_fc, b_fc = params
    B, T, _ = x.shape
    H = hidden_size
    inp = x
    for l in range(num_layers):
        h = jnp.zeros((B, H), jnp.float32)
        hs = []
        for t in range(T):
            h = jnp.tanh(inp[:, t] @ w_ih_list[l].T + b_ih_list[l]
                         + h @ w_hh_list[l].T + b_hh_list[l])
            hs.append(h)
        inp = jnp.stack(hs, axis=1)
    return inp[:, -1] @ w_fc.T + b_fc


def init_params(key, input_size, hidden_size, num_layers, num_classes):
    """Deterministic synthetic init (PyTorch-style U(-1/sqrt(H), 1/sqrt(H)))."""
    H = hidden_size
    bound = 1.0 / jnp.sqrt(jnp.float32(H))
    keys = jax.random.split(key, 4 * num_layers + 2)
    w_ih, w_hh, b_ih, b_hh = [], [], [], []
    ki = 0
    for l in range(num_layers):
        in_l = input_size if l == 0 else H
        w_ih.append(jax.random.uniform(keys[ki], (H, in_l), jnp.float32,
                                       -bound, bound)); ki += 1
        w_hh.append(jax.random.uniform(keys[ki], (H, H), jnp.float32,
                                       -bound, bound)); ki += 1
        b_ih.append(jax.random.uniform(keys[ki], (H,), jnp.float32,
                                       -bound, bound)); ki += 1
        b_hh.append(jax.random.uniform(keys[ki], (H,), jnp.float32,
                                       -bound, bound)); ki += 1
    w_fc = jax.random.uniform(keys[ki], (num_classes, H), jnp.float32,
                              -bound, bound); ki += 1
    b_fc = jax.random.uniform(keys[ki], (num_classes,), jnp.float32,
                              -bound, bound)
    return (w_ih, w_hh, b_ih, b_hh, w_fc, b_fc)


if __name__ == "__main__":
    # Small shapes consistent with the module's forward.
    BATCH, SEQ, INPUT, HIDDEN, LAYERS, CLASSES = 8, 8, 16, 32, 2, 10

    key = jax.random.PRNGKey(0)
    k_x, k_p = jax.random.split(key)
    x = jax.random.normal(k_x, (BATCH, SEQ, INPUT), jnp.float32)
    params = init_params(k_p, INPUT, HIDDEN, LAYERS, CLASSES)

    out = rnn_forward_pallas(x, params, hidden_size=HIDDEN,
                             num_layers=LAYERS, num_classes=CLASSES)
    out = jax.block_until_ready(out)

    ref = rnn_forward_ref(x, params, hidden_size=HIDDEN, num_layers=LAYERS)
    assert out.shape == (BATCH, CLASSES)
    assert jnp.allclose(out, ref, atol=1e-5, rtol=1e-5), \
        f"mismatch: max abs err {jnp.max(jnp.abs(out - ref))}"

    print("KERNEL_OK")
</pallas_src>

<mosaic_0001>
module attributes {stable_mosaic.version = 11 : i64} {
  func.func @_rnn_kernel(%arg0: i32, %arg1: memref<64x128xf32, #tpu.memory_space<vmem>>, %arg2: memref<2x128x128xf32, #tpu.memory_space<vmem>>, %arg3: memref<2x128x128xf32, #tpu.memory_space<vmem>>, %arg4: memref<2x1x128xf32, #tpu.memory_space<vmem>>, %arg5: memref<128x128xf32, #tpu.memory_space<vmem>>, %arg6: memref<1x128xf32, #tpu.memory_space<vmem>>, %arg7: memref<8x128xf32, #tpu.memory_space<vmem>>, %arg8: memref<64x128xf32, #tpu.memory_space<vmem>>) attributes {dimension_semantics = [#tpu.dimension_semantics<arbitrary>], iteration_bounds = array<i64: 1>, scalar_prefetch = 0 : i64, scratch_operands = 1 : i64, tpu.core_type = #tpu.core_type<tc>, window_params = [{pipeline_mode = #tpu.pipeline_mode<synchronous>, transform_indices = @transform_0, window_bounds = array<i64: 64, 128>}, {pipeline_mode = #tpu.pipeline_mode<synchronous>, transform_indices = @transform_1, window_bounds = array<i64: 2, 128, 128>}, {pipeline_mode = #tpu.pipeline_mode<synchronous>, transform_indices = @transform_2, window_bounds = array<i64: 2, 128, 128>}, {pipeline_mode = #tpu.pipeline_mode<synchronous>, transform_indices = @transform_3, window_bounds = array<i64: 2, 1, 128>}, {pipeline_mode = #tpu.pipeline_mode<synchronous>, transform_indices = @transform_4, window_bounds = array<i64: 128, 128>}, {pipeline_mode = #tpu.pipeline_mode<synchronous>, transform_indices = @transform_5, window_bounds = array<i64: 1, 128>}, {pipeline_mode = #tpu.pipeline_mode<synchronous>, transform_indices = @transform_6, window_bounds = array<i64: 8, 128>}]} {
    %c0 = arith.constant 0 : index
    %c0_0 = arith.constant 0 : index
    %0 = vector.load %arg1[%c0, %c0_0] : memref<64x128xf32, #tpu.memory_space<vmem>>, vector<64x128xf32>
    %c0_1 = arith.constant 0 : index
    %c0_2 = arith.constant 0 : index
    %c0_3 = arith.constant 0 : index
    %1 = vector.load %arg2[%c0_1, %c0_2, %c0_3] : memref<2x128x128xf32, #tpu.memory_space<vmem>>, vector<1x128x128xf32>
    %2 = vector.shape_cast %1 : vector<1x128x128xf32> to vector<128x128xf32>
    %cst = arith.constant dense<0.000000e+00> : vector<64x128xf32>
    %3 = tpu.matmul %0, %2, %cst {dimension_numbers = #tpu.dot_dimension_numbers<[1], [0], [0], [1], [0, 0, 1, 1], [], []>} : vector<64x128xf32>, vector<128x128xf32>, vector<64x128xf32> -> vector<64x128xf32>
    %c0_4 = arith.constant 0 : index
    %c0_5 = arith.constant 0 : index
    %c0_6 = arith.constant 0 : index
    %4 = vector.load %arg4[%c0_4, %c0_5, %c0_6] : memref<2x1x128xf32, #tpu.memory_space<vmem>>, vector<1x1x128xf32>
    %5 = vector.shape_cast %4 : vector<1x1x128xf32> to vector<1x128xf32>
    %6 = vector.broadcast %5 : vector<1x128xf32> to vector<64x128xf32>
    %7 = arith.addf %3, %6 : vector<64x128xf32>
    %c0_7 = arith.constant 0 : index
    %c0_8 = arith.constant 0 : index
    %8 = vector.load %arg8[%c0_7, %c0_8] : memref<64x128xf32, #tpu.memory_space<vmem>>, vector<64x128xf32>
    tpu.vector_store %arg8[%c0_7, %c0_8], %7 {strides = array<i32>} : memref<64x128xf32, #tpu.memory_space<vmem>>, vector<64x128xf32>,
    %c0_9 = arith.constant 0 : index
    %c0_10 = arith.constant 0 : index
    %c0_11 = arith.constant 0 : index
    %9 = vector.load %arg3[%c0_9, %c0_10, %c0_11] : memref<2x128x128xf32, #tpu.memory_space<vmem>>, vector<1x128x128xf32>
    %10 = vector.shape_cast %9 : vector<1x128x128xf32> to vector<128x128xf32>
    %cst_12 = arith.constant 0.000000e+00 : f32
    %11 = vector.broadcast %cst_12 : f32 to vector<8x128xf32>
    %c0_13 = arith.constant 0 : index
    %c0_14 = arith.constant 0 : index
    %12 = vector.load %arg8[%c0_13, %c0_14] : memref<64x128xf32, #tpu.memory_space<vmem>>, vector<8x128xf32>
    %cst_15 = arith.constant dense<0.000000e+00> : vector<8x128xf32>
    %13 = tpu.matmul %11, %10, %cst_15 {dimension_numbers = #tpu.dot_dimension_numbers<[1], [0], [0], [1], [0, 0, 1, 1], [], []>} : vector<8x128xf32>, vector<128x128xf32>, vector<8x128xf32> -> vector<8x128xf32>
    %14 = arith.addf %12, %13 : vector<8x128xf32>
    %15 = math.tanh %14 : vector<8x128xf32>
    %c0_16 = arith.constant 0 : index
    %c0_17 = arith.constant 0 : index
    %16 = vector.load %arg8[%c0_16, %c0_17] : memref<64x128xf32, #tpu.memory_space<vmem>>, vector<8x128xf32>
    tpu.vector_store %arg8[%c0_16, %c0_17], %15 {strides = array<i32>} : memref<64x128xf32, #tpu.memory_space<vmem>>, vector<8x128xf32>,
    %c8 = arith.constant 8 : index
    %c0_18 = arith.constant 0 : index
    %17 = vector.load %arg8[%c8, %c0_18] : memref<64x128xf32, #tpu.memory_space<vmem>>, vector<8x128xf32>
    %cst_19 = arith.constant dense<0.000000e+00> : vector<8x128xf32>
    %18 = tpu.matmul %15, %10, %cst_19 {dimension_numbers = #tpu.dot_dimension_numbers<[1], [0], [0], [1], [0, 0, 1, 1], [], []>} : vector<8x128xf32>, vector<128x128xf32>, vector<8x128xf32> -> vector<8x128xf32>
    %19 = arith.addf %17, %18 : vector<8x128xf32>
    %20 = math.tanh %19 : vector<8x128xf32>
    %c8_20 = arith.constant 8 : index
    %c0_21 = arith.constant 0 : index
    %21 = vector.load %arg8[%c8_20, %c0_21] : memref<64x128xf32, #tpu.memory_space<vmem>>, vector<8x128xf32>
    tpu.vector_store %arg8[%c8_20, %c0_21], %20 {strides = array<i32>} : memref<64x128xf32, #tpu.memory_space<vmem>>, vector<8x128xf32>,
    %c16 = arith.constant 16 : index
    %c0_22 = arith.constant 0 : index
    %22 = vector.load %arg8[%c16, %c0_22] : memref<64x128xf32, #tpu.memory_space<vmem>>, vector<8x128xf32>
    %cst_23 = arith.constant dense<0.000000e+00> : vector<8x128xf32>
    %23 = tpu.matmul %20, %10, %cst_23 {dimension_numbers = #tpu.dot_dimension_numbers<[1], [0], [0], [1], [0, 0, 1, 1], [], []>} : vector<8x128xf32>, vector<128x128xf32>, vector<8x128xf32> -> vector<8x128xf32>
    %24 = arith.addf %22, %23 : vector<8x128xf32>
    %25 = math.tanh %24 : vector<8x128xf32>
    %c16_24 = arith.constant 16 : index
    %c0_25 = arith.constant 0 : index
    %26 = vector.load %arg8[%c16_24, %c0_25] : memref<64x128xf32, #tpu.memory_space<vmem>>, vector<8x128xf32>
    tpu.vector_store %arg8[%c16_24, %c0_25], %25 {strides = array<i32>} : memref<64x128xf32, #tpu.memory_space<vmem>>, vector<8x128xf32>,
    %c24 = arith.constant 24 : index
    %c0_26 = arith.constant 0 : index
    %27 = vector.load %arg8[%c24, %c0_26] : memref<64x128xf32, #tpu.memory_space<vmem>>, vector<8x128xf32>
    %cst_27 = arith.constant dense<0.000000e+00> : vector<8x128xf32>
    %28 = tpu.matmul %25, %10, %cst_27 {dimension_numbers = #tpu.dot_dimension_numbers<[1], [0], [0], [1], [0, 0, 1, 1], [], []>} : vector<8x128xf32>, vector<128x128xf32>, vector<8x128xf32> -> vector<8x128xf32>
    %29 = arith.addf %27, %28 : vector<8x128xf32>
    %30 = math.tanh %29 : vector<8x128xf32>
    %c24_28 = arith.constant 24 : index
    %c0_29 = arith.constant 0 : index
    %31 = vector.load %arg8[%c24_28, %c0_29] : memref<64x128xf32, #tpu.memory_space<vmem>>, vector<8x128xf32>
    tpu.vector_store %arg8[%c24_28, %c0_29], %30 {strides = array<i32>} : memref<64x128xf32, #tpu.memory_space<vmem>>, vector<8x128xf32>,
    %c32 = arith.constant 32 : index
    %c0_30 = arith.constant 0 : index
    %32 = vector.load %arg8[%c32, %c0_30] : memref<64x128xf32, #tpu.memory_space<vmem>>, vector<8x128xf32>
    %cst_31 = arith.constant dense<0.000000e+00> : vector<8x128xf32>
    %33 = tpu.matmul %30, %10, %cst_31 {dimension_numbers = #tpu.dot_dimension_numbers<[1], [0], [0], [1], [0, 0, 1, 1], [], []>} : vector<8x128xf32>, vector<128x128xf32>, vector<8x128xf32> -> vector<8x128xf32>
    %34 = arith.addf %32, %33 : vector<8x128xf32>
    %35 = math.tanh %34 : vector<8x128xf32>
    %c32_32 = arith.constant 32 : index
    %c0_33 = arith.constant 0 : index
    %36 = vector.load %arg8[%c32_32, %c0_33] : memref<64x128xf32, #tpu.memory_space<vmem>>, vector<8x128xf32>
    tpu.vector_store %arg8[%c32_32, %c0_33], %35 {strides = array<i32>} : memref<64x128xf32, #tpu.memory_space<vmem>>, vector<8x128xf32>,
    %c40 = arith.constant 40 : index
    %c0_34 = arith.constant 0 : index
    %37 = vector.load %arg8[%c40, %c0_34] : memref<64x128xf32, #tpu.memory_space<vmem>>, vector<8x128xf32>
    %cst_35 = arith.constant dense<0.000000e+00> : vector<8x128xf32>
    %38 = tpu.matmul %35, %10, %cst_35 {dimension_numbers = #tpu.dot_dimension_numbers<[1], [0], [0], [1], [0, 0, 1, 1], [], []>} : vector<8x128xf32>, vector<128x128xf32>, vector<8x128xf32> -> vector<8x128xf32>
    %39 = arith.addf %37, %38 : vector<8x128xf32>
    %40 = math.tanh %39 : vector<8x128xf32>
    %c40_36 = arith.constant 40 : index
    %c0_37 = arith.constant 0 : index
    %41 = vector.load %arg8[%c40_36, %c0_37] : memref<64x128xf32, #tpu.memory_space<vmem>>, vector<8x128xf32>
    tpu.vector_store %arg8[%c40_36, %c0_37], %40 {strides = array<i32>} : memref<64x128xf32, #tpu.memory_space<vmem>>, vector<8x128xf32>,
    %c48 = arith.constant 48 : index
    %c0_38 = arith.constant 0 : index
    %42 = vector.load %arg8[%c48, %c0_38] : memref<64x128xf32, #tpu.memory_space<vmem>>, vector<8x128xf32>
    %cst_39 = arith.constant dense<0.000000e+00> : vector<8x128xf32>
    %43 = tpu.matmul %40, %10, %cst_39 {dimension_numbers = #tpu.dot_dimension_numbers<[1], [0], [0], [1], [0, 0, 1, 1], [], []>} : vector<8x128xf32>, vector<128x128xf32>, vector<8x128xf32> -> vector<8x128xf32>
    %44 = arith.addf %42, %43 : vector<8x128xf32>
    %45 = math.tanh %44 : vector<8x128xf32>
    %c48_40 = arith.constant 48 : index
    %c0_41 = arith.constant 0 : index
    %46 = vector.load %arg8[%c48_40, %c0_41] : memref<64x128xf32, #tpu.memory_space<vmem>>, vector<8x128xf32>
    tpu.vector_store %arg8[%c48_40, %c0_41], %45 {strides = array<i32>} : memref<64x128xf32, #tpu.memory_space<vmem>>, vector<8x128xf32>,
    %c56 = arith.constant 56 : index
    %c0_42 = arith.constant 0 : index
    %47 = vector.load %arg8[%c56, %c0_42] : memref<64x128xf32, #tpu.memory_space<vmem>>, vector<8x128xf32>
    %cst_43 = arith.constant dense<0.000000e+00> : vector<8x128xf32>
    %48 = tpu.matmul %45, %10, %cst_43 {dimension_numbers = #tpu.dot_dimension_numbers<[1], [0], [0], [1], [0, 0, 1, 1], [], []>} : vector<8x128xf32>, vector<128x128xf32>, vector<8x128xf32> -> vector<8x128xf32>
    %49 = arith.addf %47, %48 : vector<8x128xf32>
    %50 = math.tanh %49 : vector<8x128xf32>
    %c56_44 = arith.constant 56 : index
    %c0_45 = arith.constant 0 : index
    %51 = vector.load %arg8[%c56_44, %c0_45] : memref<64x128xf32, #tpu.memory_space<vmem>>, vector<8x128xf32>
    tpu.vector_store %arg8[%c56_44, %c0_45], %50 {strides = array<i32>} : memref<64x128xf32, #tpu.memory_space<vmem>>, vector<8x128xf32>,
    %c0_46 = arith.constant 0 : index
    %c0_47 = arith.constant 0 : index
    %52 = vector.load %arg8[%c0_46, %c0_47] : memref<64x128xf32, #tpu.memory_space<vmem>>, vector<64x128xf32>
    %c1 = arith.constant 1 : index
    %c0_48 = arith.constant 0 : index
    %c0_49 = arith.constant 0 : index
    %53 = vector.load %arg2[%c1, %c0_48, %c0_49] : memref<2x128x128xf32, #tpu.memory_space<vmem>>, vector<1x128x128xf32>
    %54 = vector.shape_cast %53 : vector<1x128x128xf32> to vector<128x128xf32>
    %cst_50 = arith.constant dense<0.000000e+00> : vector<64x128xf32>
    %55 = tpu.matmul %52, %54, %cst_50 {dimension_numbers = #tpu.dot_dimension_numbers<[1], [0], [0], [1], [0, 0, 1, 1], [], []>} : vector<64x128xf32>, vector<128x128xf32>, vector<64x128xf32> -> vector<64x128xf32>
    %c1_51 = arith.constant 1 : index
    %c0_52 = arith.constant 0 : index
    %c0_53 = arith.constant 0 : index
    %56 = vector.load %arg4[%c1_51, %c0_52, %c0_53] : memref<2x1x128xf32, #tpu.memory_space<vmem>>, vector<1x1x128xf32>
    %57 = vector.shape_cast %56 : vector<1x1x128xf32> to vector<1x128xf32>
    %58 = vector.broadcast %57 : vector<1x128xf32> to vector<64x128xf32>
    %59 = arith.addf %55, %58 : vector<64x128xf32>
    %c0_54 = arith.constant 0 : index
    %c0_55 = arith.constant 0 : index
    %60 = vector.load %arg8[%c0_54, %c0_55] : memref<64x128xf32, #tpu.memory_space<vmem>>, vector<64x128xf32>
    tpu.vector_store %arg8[%c0_54, %c0_55], %59 {strides = array<i32>} : memref<64x128xf32, #tpu.memory_space<vmem>>, vector<64x128xf32>,
    %c1_56 = arith.constant 1 : index
    %c0_57 = arith.constant 0 : index
    %c0_58 = arith.constant 0 : index
    %61 = vector.load %arg3[%c1_56, %c0_57, %c0_58] : memref<2x128x128xf32, #tpu.memory_space<vmem>>, vector<1x128x128xf32>
    %62 = vector.shape_cast %61 : vector<1x128x128xf32> to vector<128x128xf32>
    %cst_59 = arith.constant 0.000000e+00 : f32
    %63 = vector.broadcast %cst_59 : f32 to vector<8x128xf32>
    %c0_60 = arith.constant 0 : index
    %c0_61 = arith.constant 0 : index
    %64 = vector.load %arg8[%c0_60, %c0_61] : memref<64x128xf32, #tpu.memory_space<vmem>>, vector<8x128xf32>
    %cst_62 = arith.constant dense<0.000000e+00> : vector<8x128xf32>
    %65 = tpu.matmul %63, %62, %cst_62 {dimension_numbers = #tpu.dot_dimension_numbers<[1], [0], [0], [1], [0, 0, 1, 1], [], []>} : vector<8x128xf32>, vector<128x128xf32>, vector<8x128xf32> -> vector<8x128xf32>
    %66 = arith.addf %64, %65 : vector<8x128xf32>
    %67 = math.tanh %66 : vector<8x128xf32>
    %c8_63 = arith.constant 8 : index
    %c0_64 = arith.constant 0 : index
    %68 = vector.load %arg8[%c8_63, %c0_64] : memref<64x128xf32, #tpu.memory_space<vmem>>, vector<8x128xf32>
    %cst_65 = arith.constant dense<0.000000e+00> : vector<8x128xf32>
    %69 = tpu.matmul %67, %62, %cst_65 {dimension_numbers = #tpu.dot_dimension_numbers<[1], [0], [0], [1], [0, 0, 1, 1], [], []>} : vector<8x128xf32>, vector<128x128xf32>, vector<8x128xf32> -> vector<8x128xf32>
    %70 = arith.addf %68, %69 : vector<8x128xf32>
    %71 = math.tanh %70 : vector<8x128xf32>
    %c16_66 = arith.constant 16 : index
    %c0_67 = arith.constant 0 : index
    %72 = vector.load %arg8[%c16_66, %c0_67] : memref<64x128xf32, #tpu.memory_space<vmem>>, vector<8x128xf32>
    %cst_68 = arith.constant dense<0.000000e+00> : vector<8x128xf32>
    %73 = tpu.matmul %71, %62, %cst_68 {dimension_numbers = #tpu.dot_dimension_numbers<[1], [0], [0], [1], [0, 0, 1, 1], [], []>} : vector<8x128xf32>, vector<128x128xf32>, vector<8x128xf32> -> vector<8x128xf32>
    %74 = arith.addf %72, %73 : vector<8x128xf32>
    %75 = math.tanh %74 : vector<8x128xf32>
    %c24_69 = arith.constant 24 : index
    %c0_70 = arith.constant 0 : index
    %76 = vector.load %arg8[%c24_69, %c0_70] : memref<64x128xf32, #tpu.memory_space<vmem>>, vector<8x128xf32>
    %cst_71 = arith.constant dense<0.000000e+00> : vector<8x128xf32>
    %77 = tpu.matmul %75, %62, %cst_71 {dimension_numbers = #tpu.dot_dimension_numbers<[1], [0], [0], [1], [0, 0, 1, 1], [], []>} : vector<8x128xf32>, vector<128x128xf32>, vector<8x128xf32> -> vector<8x128xf32>
    %78 = arith.addf %76, %77 : vector<8x128xf32>
    %79 = math.tanh %78 : vector<8x128xf32>
    %c32_72 = arith.constant 32 : index
    %c0_73 = arith.constant 0 : index
    %80 = vector.load %arg8[%c32_72, %c0_73] : memref<64x128xf32, #tpu.memory_space<vmem>>, vector<8x128xf32>
    %cst_74 = arith.constant dense<0.000000e+00> : vector<8x128xf32>
    %81 = tpu.matmul %79, %62, %cst_74 {dimension_numbers = #tpu.dot_dimension_numbers<[1], [0], [0], [1], [0, 0, 1, 1], [], []>} : vector<8x128xf32>, vector<128x128xf32>, vector<8x128xf32> -> vector<8x128xf32>
    %82 = arith.addf %80, %81 : vector<8x128xf32>
    %83 = math.tanh %82 : vector<8x128xf32>
    %c40_75 = arith.constant 40 : index
    %c0_76 = arith.constant 0 : index
    %84 = vector.load %arg8[%c40_75, %c0_76] : memref<64x128xf32, #tpu.memory_space<vmem>>, vector<8x128xf32>
    %cst_77 = arith.constant dense<0.000000e+00> : vector<8x128xf32>
    %85 = tpu.matmul %83, %62, %cst_77 {dimension_numbers = #tpu.dot_dimension_numbers<[1], [0], [0], [1], [0, 0, 1, 1], [], []>} : vector<8x128xf32>, vector<128x128xf32>, vector<8x128xf32> -> vector<8x128xf32>
    %86 = arith.addf %84, %85 : vector<8x128xf32>
    %87 = math.tanh %86 : vector<8x128xf32>
    %c48_78 = arith.constant 48 : index
    %c0_79 = arith.constant 0 : index
    %88 = vector.load %arg8[%c48_78, %c0_79] : memref<64x128xf32, #tpu.memory_space<vmem>>, vector<8x128xf32>
    %cst_80 = arith.constant dense<0.000000e+00> : vector<8x128xf32>
    %89 = tpu.matmul %87, %62, %cst_80 {dimension_numbers = #tpu.dot_dimension_numbers<[1], [0], [0], [1], [0, 0, 1, 1], [], []>} : vector<8x128xf32>, vector<128x128xf32>, vector<8x128xf32> -> vector<8x128xf32>
    %90 = arith.addf %88, %89 : vector<8x128xf32>
    %91 = math.tanh %90 : vector<8x128xf32>
    %c56_81 = arith.constant 56 : index
    %c0_82 = arith.constant 0 : index
    %92 = vector.load %arg8[%c56_81, %c0_82] : memref<64x128xf32, #tpu.memory_space<vmem>>, vector<8x128xf32>
    %cst_83 = arith.constant dense<0.000000e+00> : vector<8x128xf32>
    %93 = tpu.matmul %91, %62, %cst_83 {dimension_numbers = #tpu.dot_dimension_numbers<[1], [0], [0], [1], [0, 0, 1, 1], [], []>} : vector<8x128xf32>, vector<128x128xf32>, vector<8x128xf32> -> vector<8x128xf32>
    %94 = arith.addf %92, %93 : vector<8x128xf32>
    %95 = math.tanh %94 : vector<8x128xf32>
    %c0_84 = arith.constant 0 : index
    %c0_85 = arith.constant 0 : index
    %96 = vector.load %arg5[%c0_84, %c0_85] : memref<128x128xf32, #tpu.memory_space<vmem>>, vector<128x128xf32>
    %cst_86 = arith.constant dense<0.000000e+00> : vector<8x128xf32>
    %97 = tpu.matmul %95, %96, %cst_86 {dimension_numbers = #tpu.dot_dimension_numbers<[1], [0], [0], [1], [0, 0, 1, 1], [], []>} : vector<8x128xf32>, vector<128x128xf32>, vector<8x128xf32> -> vector<8x128xf32>
    %c0_87 = arith.constant 0 : index
    %c0_88 = arith.constant 0 : index
    %98 = vector.load %arg6[%c0_87, %c0_88] : memref<1x128xf32, #tpu.memory_space<vmem>>, vector<1x128xf32>
    %99 = vector.broadcast %98 : vector<1x128xf32> to vector<8x128xf32>
    %100 = arith.addf %97, %99 : vector<8x128xf32>
    %c0_89 = arith.constant 0 : index
    %c0_90 = arith.constant 0 : index
    %101 = vector.load %arg7[%c0_89, %c0_90] : memref<8x128xf32, #tpu.memory_space<vmem>>, vector<8x128xf32>
    tpu.vector_store %arg7[%c0_89, %c0_90], %100 {strides = array<i32>} : memref<8x128xf32, #tpu.memory_space<vmem>>, vector<8x128xf32>,
    return
  }
  func.func @transform_0(%arg0: i32) -> (i32, i32) {
    %c0_i32 = arith.constant 0 : i32
    %c0_i32_0 = arith.constant 0 : i32
    %c0_i32_1 = arith.constant 0 : i32
    return %c0_i32, %c0_i32_0 : i32, i32
  }
  func.func @transform_1(%arg0: i32) -> (i32, i32, i32) {
    %c0_i32 = arith.constant 0 : i32
    %c0_i32_0 = arith.constant 0 : i32
    %c0_i32_1 = arith.constant 0 : i32
    %c0_i32_2 = arith.constant 0 : i32
    return %c0_i32, %c0_i32_0, %c0_i32_1 : i32, i32, i32
  }
  func.func @transform_2(%arg0: i32) -> (i32, i32, i32) {
    %c0_i32 = arith.constant 0 : i32
    %c0_i32_0 = arith.constant 0 : i32
    %c0_i32_1 = arith.constant 0 : i32
    %c0_i32_2 = arith.constant 0 : i32
    return %c0_i32, %c0_i32_0, %c0_i32_1 : i32, i32, i32
  }
  func.func @transform_3(%arg0: i32) -> (i32, i32, i32) {
    %c0_i32 = arith.constant 0 : i32
    %c0_i32_0 = arith.constant 0 : i32
    %c0_i32_1 = arith.constant 0 : i32
    %c0_i32_2 = arith.constant 0 : i32
    return %c0_i32, %c0_i32_0, %c0_i32_1 : i32, i32, i32
  }
  func.func @transform_4(%arg0: i32) -> (i32, i32) {
    %c0_i32 = arith.constant 0 : i32
    %c0_i32_0 = arith.constant 0 : i32
    %c0_i32_1 = arith.constant 0 : i32
    return %c0_i32, %c0_i32_0 : i32, i32
  }
  func.func @transform_5(%arg0: i32) -> (i32, i32) {
    %c0_i32 = arith.constant 0 : i32
    %c0_i32_0 = arith.constant 0 : i32
    %c0_i32_1 = arith.constant 0 : i32
    return %c0_i32, %c0_i32_0 : i32, i32
  }
  func.func @transform_6(%arg0: i32) -> (i32, i32) {
    %c0_i32 = arith.constant 0 : i32
    %c0_i32_0 = arith.constant 0 : i32
    %c0_i32_1 = arith.constant 0 : i32
    return %c0_i32, %c0_i32_0 : i32, i32
  }
}

</mosaic_0001>

<bundles_post_ra>
// kernel: tpu_custom_call.1
= control target key start
LH: loop header
LB: loop body
LE: loop exit
PB: predicated region body
PF: predicated region fallthrough
CT: control target
= control target key end

     0   :  { %11 = vsyncpa [#allocation4], 0  ;;  %s3890_s0 = inlined_call_operand.hbm [shape: f32[64,128], index: 0, kind: input, shape index: {}]   ;;  %s3891_s1 = inlined_call_operand.hbm [shape: f32[2,128,128], index: 1, kind: input, shape index: {}]   ;;  %s3892_s2 = inlined_call_operand.hbm [shape: f32[2,128,128], index: 2, kind: input, shape index: {}]   ;;  %s3893_s3 = inlined_call_operand.vmem [shape: f32[2,1,128], index: 3, kind: input, shape index: {}]   ;;  %s3894_s4 = inlined_call_operand.hbm [shape: f32[128,128], index: 4, kind: input, shape index: {}]   ;;  %s3895_s5 = inlined_call_operand.vmem [shape: f32[1,128], index: 5, kind: input, shape index: {}]   ;;  %s3896_s6 = inlined_call_operand.hbm [shape: f32[8,128], index: 6, kind: output, shape index: {}]  }
   0x1   :  { %12 = vsyncpa [#allocation7], 0 }
   0x2   :  { %13 = vsyncpa [#allocation10], 0 }
   0x3   :  { %14 = vsyncpa [#allocation5], 0  ;;  %s3345_s21 = smov [#allocation6]   ;;  %s3346_s23 = smov [#allocation3]  }
   0x4   :  { %s32_s22 = sshll.u32 %s3345_s21, 4  ;;  %s20_s24 = sshll.u32 %s3346_s23, 4  ;;  %s33_s22 = int_to_ptr.vmem [resolvable:$true] %s32_s22  ;;  %s3390_s24 = int_to_ptr.vmem [resolvable:$true] %s20_s24 }
   0x5   :  { %s3227_s27 = scalar_lea.hbm %s3891_s1, 4096 }
   0x6   :  { %p3228_p0 = scmp.ne.s32.totalorder %s3891_s1, %s3227_s27  ;;  %p3231_p1 = scmp.lt.u32.totalorder %s3227_s27, %s3891_s1 }
   0x8   :  { %p3233_p2 = pnand %p3231_p1, %p3228_p0 }
   0xa   :  { %3236 = shalt.err (!%p3233_p2)
}
   0xb   :  { %s3237_s8 = scalar_lea.vmem %s33_s22, 4096  ;;  %p3242_p4 = scmp.lt.s32.totalorder %s33_s22, %s33_s22 }
   0xc   :  { %p3238_p3 = scmp.ne.s32.totalorder %s33_s22, %s3237_s8  ;;  %p3243_p5 = scmp.lt.s32.totalorder %s3237_s8, %s3237_s8 }
   0xe   :  { %p3244_p6 = por %p3243_p5, %p3242_p4 }
  0x10   :  { %p3245_p7 = pnand %p3244_p6, %p3238_p3 }
  0x12   :  { %3248 = shalt.err (!%p3245_p7)
}
  0x13   :  { %s3347_s9 = smov 128   ;;  %s3348_s10 = smov 8  }
  0x14   :  { %38 = dma.hbm_to_vmem [thread:$0]  %s3891_s1, 4096, %s33_s22, [#allocation7], %s3347_s9, %s3347_s9, %s3348_s10  }
  0x15   :  { %s3249_s15 = scalar_lea.hbm %s3890_s0, 1024 }
  0x16   :  { %p3250_p8 = scmp.ne.s32.totalorder %s3890_s0, %s3249_s15  ;;  %p3253_p9 = scmp.lt.u32.totalorder %s3249_s15, %s3890_s0 }
  0x18   :  { %p3255_p10 = pnand %p3253_p9, %p3250_p8 }
  0x1a   :  { %3258 = shalt.err (!%p3255_p10)
}
  0x1b   :  { %s3259_s20 = scalar_lea.vmem %s3390_s24, 1024  ;;  %p3264_p12 = scmp.lt.s32.totalorder %s3390_s24, %s3390_s24 }
  0x1c   :  { %p3260_p11 = scmp.ne.s32.totalorder %s3390_s24, %s3259_s20  ;;  %p3265_p13 = scmp.lt.s32.totalorder %s3259_s20, %s3259_s20 }
  0x1e   :  { %p3266_p0 = por %p3265_p13, %p3264_p12 }
  0x20   :  { %p3267_p1 = pnand %p3266_p0, %p3260_p11 }
  0x22   :  { %3270 = shalt.err (!%p3267_p1)
}
  0x23   :  { %26 = dma.hbm_to_vmem [thread:$0]  %s3890_s0, 1024, %s3390_s24, [#allocation4], %s3347_s9, %s3347_s9, %s3348_s10  }
  0x24   :  { %s3349_s22 = smov [#allocation8]   ;;  %s3350_s25 = smov [#allocation9]  }
  0x25   :  { %s44_s23 = sshll.u32 %s3349_s22, 4  ;;  %s58_s26 = sshll.u32 %s3350_s25, 4  ;;  %s45_s23 = int_to_ptr.vmem [resolvable:$true] %s44_s23  ;;  %s3427_s26 = int_to_ptr.vmem [resolvable:$true] %s58_s26 }
  0x26   :  { %s3271_s29 = scalar_lea.hbm %s3892_s2, 4096 }
  0x27   :  { %p3272_p2 = scmp.ne.s32.totalorder %s3892_s2, %s3271_s29  ;;  %p3275_p3 = scmp.lt.u32.totalorder %s3271_s29, %s3892_s2 }
  0x29   :  { %p3277_p4 = pnand %p3275_p3, %p3272_p2 }
  0x2b   :  { %3280 = shalt.err (!%p3277_p4)
}
  0x2c   :  { %s3281_s0 = scalar_lea.vmem %s45_s23, 4096  ;;  %p3286_p6 = scmp.lt.s32.totalorder %s45_s23, %s45_s23 }
  0x2d   :  { %p3282_p5 = scmp.ne.s32.totalorder %s45_s23, %s3281_s0  ;;  %p3287_p7 = scmp.lt.s32.totalorder %s3281_s0, %s3281_s0 }
  0x2f   :  { %p3288_p8 = por %p3287_p7, %p3286_p6 }
  0x31   :  { %p3289_p9 = pnand %p3288_p8, %p3282_p5 }
  0x33   :  { %3292 = shalt.err (!%p3289_p9)
}
  0x34   :  { %50 = dma.hbm_to_vmem [thread:$0]  %s3892_s2, 4096, %s45_s23, [#allocation7], %s3347_s9, %s3347_s9, %s3348_s10  }
  0x35   :  { %s3293_s15 = scalar_lea.hbm %s3894_s4, 2048 }
  0x36   :  { %p3294_p10 = scmp.ne.s32.totalorder %s3894_s4, %s3293_s15  ;;  %p3297_p11 = scmp.lt.u32.totalorder %s3293_s15, %s3894_s4 }
  0x38   :  { %p3299_p12 = pnand %p3297_p11, %p3294_p10 }
  0x3a   :  { %3302 = shalt.err (!%p3299_p12)
}
  0x3b   :  { %s3303_s20 = scalar_lea.vmem %s3427_s26, 2048  ;;  %p3308_p0 = scmp.lt.s32.totalorder %s3427_s26, %s3427_s26 }
  0x3c   :  { %p3304_p13 = scmp.ne.s32.totalorder %s3427_s26, %s3303_s20  ;;  %p3309_p1 = scmp.lt.s32.totalorder %s3303_s20, %s3303_s20 }
  0x3e   :  { %p3310_p2 = por %p3309_p1, %p3308_p0 }
  0x40   :  { %p3311_p3 = pnand %p3310_p2, %p3304_p13 }
  0x42   :  { %3314 = shalt.err (!%p3311_p3)
}
  0x43   :  { %64 = dma.hbm_to_vmem [thread:$0]  %s3894_s4, 2048, %s3427_s26, [#allocation10], %s3347_s9, %s3347_s9, %s3348_s10  }
  0x44   :  { %3337 = dma.done.wait [#allocation4], 1024  }
  0x45   :  { %3338 = vsyncadd [#allocation4], 4294966272 }
  0x46   :  { %3339 = dma.done.wait [#allocation7], 8192  }
  0x47   :  { %3340 = vsyncadd [#allocation7], 4294959104 }
  0x48   :  { %3341 = dma.done.wait [#allocation10], 2048  }
  0x49   :  { %3342 = vsyncadd [#allocation10], 4294965248  ;;  %v3351_v0 = vmov 0.0|0.0   ;;  %vm3352_vm0 = vmmov 0   ;;  %v3353_v1 = vmov 0.0   ;;  %v87_v2 = vld [vmem:[#allocation6] sm:$0xff] }
  0x4a   :  { %2745 = vmatprep.subr.bf16.mxu1 %v3351_v0  ;;  %2106 = vmatprep.mubr.msk.f32.mxu1 %vm3352_vm0, %v3353_v1  ;;  %v88_v3 = vld [vmem:[#allocation6 + $0x8] sm:$0xff]  ;;  %v223_v4 = vld [vmem:[#allocation8] sm:$0xff]  ;;  %v89_v7 = vld [vmem:[#allocation6 + $0x10] sm:$0xff]  ;;  %s3354_s23 = smov [#allocation11]  }
  0x4b   :  { %v2713_v5 = vpack.c.bf16 %v88_v3, %v87_v2  ;;  %v224_v6 = vld [vmem:[#allocation8 + $0x8] sm:$0xff]  ;;  %v90_v8 = vld [vmem:[#allocation6 + $0x18] sm:$0xff]  ;;  %v225_v11 = vld [vmem:[#allocation8 + $0x10] sm:$0xff]  ;;  %s1678_s25 = sshll.u32 %s3354_s23, 4  ;;  %s1679_s25 = int_to_ptr.vmem [resolvable:$true] %s1678_s25 }
  0x4c   :  { %v3467_v9 = vpack.c.bf16 %v224_v6, %v223_v4  ;;  %v2717_v10 = vpack.c.bf16 %v90_v8, %v89_v7  ;;  %v226_v12 = vld [vmem:[#allocation8 + $0x18] sm:$0xff]  ;;  %v91_v13 = vld [vmem:[#allocation6 + $0x20] sm:$0xff]  ;;  %v92_v14 = vld [vmem:[#allocation6 + $0x28] sm:$0xff]  ;;  %s3315_s26 = scalar_lea.vmem %s1679_s25, 128  ;;  %p3320_p5 = scmp.lt.s32.totalorder %s1679_s25, %s1679_s25 }
  0x4d   :  { %2714 = vmatprep.subr.bf16.mxu0 %v2713_v5  ;;  %v3470_v15 = vpack.c.bf16 %v226_v12, %v225_v11  ;;  %v2721_v16 = vpack.c.bf16 %v92_v14, %v91_v13  ;;  %v227_v17 = vld [vmem:[#allocation8 + $0x20] sm:$0xff]  ;;  %v228_v18 = vld [vmem:[#allocation8 + $0x28] sm:$0xff]  ;;  %v93_v19 = vld [vmem:[#allocation6 + $0x30] sm:$0xff]  ;;  %p3316_p4 = scmp.ne.s32.totalorder %s1679_s25, %s3315_s26  ;;  %p3321_p6 = scmp.lt.s32.totalorder %s3315_s26, %s3315_s26 }
  0x4e   :  { %2716 = vmatpush3.bf16.msra.mxu0 %v2713_v5  ;;  %2747 = vmatpush3.bf16.msra.mxu1 %v3467_v9  ;;  %v94_v20 = vld [vmem:[#allocation6 + $0x38] sm:$0xff]  ;;  %v3474_v21 = vpack.c.bf16 %v228_v18, %v227_v17  ;;  %v229_v23 = vld [vmem:[#allocation8 + $0x30] sm:$0xff]  ;;  %v95_v25 = vld [vmem:[#allocation6 + $0x40] sm:$0xff] }
  0x4f   :  { %2718 = vmatprep.subr.bf16.mxu0 %v2717_v10  ;;  %2748 = vmatprep.subr.bf16.mxu1 %v3351_v0  ;;  %v2725_v22 = vpack.c.bf16 %v94_v20, %v93_v19  ;;  %v230_v24 = vld [vmem:[#allocation8 + $0x38] sm:$0xff]  ;;  %v96_v26 = vld [vmem:[#allocation6 + $0x48] sm:$0xff]  ;;  %v79_v27 = vld [vmem:[#allocation3] sm:$0xff]  ;;  %p3322_p7 = por %p3321_p6, %p3320_p5 }
  0x50   :  { %2062 = vmatprep.mubr.f32.mxu0 %v79_v27  ;;  %v3478_v28 = vpack.c.bf16 %v230_v24, %v229_v23  ;;  %v2729_v29 = vpack.c.bf16 %v96_v26, %v95_v25  ;;  %v231_v30 = vld [vmem:[#allocation8 + $0x40] sm:$0xff]  ;;  %v232_v31 = vld [vmem:[#allocation8 + $0x48] sm:$0xff]  ;;  %v97_v32 = vld [vmem:[#allocation6 + $0x50] sm:$0xff] }
  0x51   :  { %v98_v33 = vld [vmem:[#allocation6 + $0x58] sm:$0xff]  ;;  %v3482_v34 = vpack.c.bf16 %v232_v31, %v231_v30  ;;  %v233_v36 = vld [vmem:[#allocation8 + $0x50] sm:$0xff]  ;;  %v99_v38 = vld [vmem:[#allocation6 + $0x60] sm:$0xff]  ;;  %p3323_p8 = pnand %p3322_p7, %p3316_p4 }
  0x52   :  { %2720 = vmatpush3.bf16.msra.mxu0 %v2717_v10  ;;  %2750 = vmatpush3.bf16.msra.mxu1 %v3470_v15  ;;  %v2733_v35 = vpack.c.bf16 %v98_v33, %v97_v32  ;;  %v234_v37 = vld [vmem:[#allocation8 + $0x58] sm:$0xff]  ;;  %v100_v39 = vld [vmem:[#allocation6 + $0x68] sm:$0xff]  ;;  %v235_v42 = vld [vmem:[#allocation8 + $0x60] sm:$0xff] }
  0x53   :  { %2722 = vmatprep.subr.bf16.mxu0 %v2721_v16  ;;  %2751 = vmatprep.subr.bf16.mxu1 %v3351_v0  ;;  %v3486_v40 = vpack.c.bf16 %v234_v37, %v233_v36  ;;  %v2737_v41 = vpack.c.bf16 %v100_v39, %v99_v38  ;;  %v236_v43 = vld [vmem:[#allocation8 + $0x68] sm:$0xff]  ;;  %v101_v44 = vld [vmem:[#allocation6 + $0x70] sm:$0xff]  ;;  %v102_v45 = vld [vmem:[#allocation6 + $0x78] sm:$0xff] }
  0x54   :  { %v3490_v46 = vpack.c.bf16 %v236_v43, %v235_v42  ;;  %v2741_v47 = vpack.c.bf16 %v102_v45, %v101_v44  ;;  %v237_v48 = vld [vmem:[#allocation8 + $0x70] sm:$0xff]  ;;  %v238_v49 = vld [vmem:[#allocation8 + $0x78] sm:$0xff]  ;;  %v80_v51 = vld [vmem:[#allocation3 + $0x8] sm:$0xff] }
  0x55   :  { %v3494_v50 = vpack.c.bf16 %v238_v49, %v237_v48  ;;  %v81_v52 = vld [vmem:[#allocation3 + $0x10] sm:$0xff]  ;;  %v82_v53 = vld [vmem:[#allocation3 + $0x18] sm:$0xff]  ;;  %v83_v54 = vld [vmem:[#allocation3 + $0x20] sm:$0xff] }
  0x56   :  { %2724 = vmatpush3.bf16.msra.mxu0 %v2721_v16  ;;  %2753 = vmatpush3.bf16.msra.mxu1 %v3474_v21  ;;  %v84_v55 = vld [vmem:[#allocation3 + $0x28] sm:$0xff]  ;;  %v85_v56 = vld [vmem:[#allocation3 + $0x30] sm:$0xff]  ;;  %v86_v57 = vld [vmem:[#allocation3 + $0x38] sm:$0xff] }
  0x57   :  { %2726 = vmatprep.subr.bf16.mxu0 %v2725_v22  ;;  %2754 = vmatprep.subr.bf16.mxu1 %v3351_v0  ;;  %v3540_v58 = vld [vmem:[%s3893_s3] ss:$0 sm:$0xff]  ;;  %v842_v37 = vld [vmem:[#allocation6 + $0x90] sm:$0xff]  ;;  %v843_v38 = vld [vmem:[#allocation6 + $0x98] sm:$0xff] }
  0x58   :  { %v2941_v39 = vpack.c.bf16 %v843_v38, %v842_v37  ;;  %v845_v42 = vld [vmem:[#allocation6 + $0xa8] sm:$0xff]  ;;  %v846_v44 = vld [vmem:[#allocation6 + $0xb0] sm:$0xff]  ;;  %v847_v45 = vld [vmem:[#allocation6 + $0xb8] sm:$0xff] }
  0x59   :  { %v849_v48 = vld [vmem:[#allocation6 + $0xc8] sm:$0xff] }
  0x5a   :  { %2728 = vmatpush3.bf16.msra.mxu0 %v2725_v22  ;;  %2756 = vmatpush3.bf16.msra.mxu1 %v3478_v28 }
  0x5b   :  { %2730 = vmatprep.subr.bf16.mxu0 %v2729_v29  ;;  %2757 = vmatprep.subr.bf16.mxu1 %v3351_v0 }
  0x5e   :  { %2732 = vmatpush3.bf16.msra.mxu0 %v2729_v29  ;;  %2759 = vmatpush3.bf16.msra.mxu1 %v3482_v34 }
  0x5f   :  { %2734 = vmatprep.subr.bf16.mxu0 %v2733_v35  ;;  %2760 = vmatprep.subr.bf16.mxu1 %v3351_v0 }
  0x62   :  { %2736 = vmatpush3.bf16.msra.mxu0 %v2733_v35  ;;  %2762 = vmatpush3.bf16.msra.mxu1 %v3486_v40 }
  0x63   :  { %2738 = vmatprep.subr.bf16.mxu0 %v2737_v41  ;;  %2763 = vmatprep.subr.bf16.mxu1 %v3351_v0 }
  0x66   :  { %2740 = vmatpush3.bf16.msra.mxu0 %v2737_v41  ;;  %2765 = vmatpush3.bf16.msra.mxu1 %v3490_v46  ;;  %v844_v41 = vld [vmem:[#allocation6 + $0xa0] sm:$0xff] }
  0x67   :  { %2742 = vmatprep.subr.bf16.mxu0 %v2741_v47  ;;  %2766 = vmatprep.subr.bf16.mxu1 %v3351_v0  ;;  %v2945_v43 = vpack.c.bf16 %v845_v42, %v844_v41 }
  0x6a   :  { %2744 = vmatpush3.bf16.msra.mxu0 %v2741_v47  ;;  %2768 = vmatpush3.bf16.msra.mxu1 %v3494_v50  ;;  %v848_v47 = vld [vmem:[#allocation6 + $0xc0] sm:$0xff] }
  0x6b   :  { %2769 = vmatprep.subr.bf16.mxu0 %v3351_v0  ;;  %2793 = vmatprep.subr.bf16.mxu1 %v3351_v0  ;;  %v2953_v49 = vpack.c.bf16 %v849_v48, %v848_v47 }
  0x6d   :  { %2063 = vmatmul.mubr.f32.vlgmr.msra.gmra.mrb[0].mxu0 %v80_v51  ;;  %2107 = vmatmul.mubr.f32.vlgmr.msra.gmra.mrb[0].mxu1 %v3353_v1  ;;  %v851_v51 = vld [vmem:[#allocation6 + $0xd8] sm:$0xff] }
  0x6e   :  { %2771 = vmatpush3.bf16.msra.mxu0 %v3467_v9  ;;  %2795 = vmatpush3.bf16.msra.mxu1 %v3467_v9 }
  0x6f   :  { %2772 = vmatprep.subr.bf16.mxu0 %v3351_v0  ;;  %2796 = vmatprep.subr.bf16.mxu1 %v3351_v0 }
  0x70   :  { %2176 = vmatprep.mubr.msk.f32.mxu1 %vm3352_vm0, %v3353_v1  ;;  %2065 = vmatprep.mubr.f32.mxu0 %v81_v52 }
  0x71   :  { %2066 = vmatmul.mubr.f32.gmra.mrb[2].mxu0 %v82_v53  ;;  %v852_v53 = vld [vmem:[#allocation6 + $0xe0] sm:$0xff] }
  0x72   :  { %2774 = vmatpush3.bf16.msra.mxu0 %v3470_v15  ;;  %2798 = vmatpush3.bf16.msra.mxu1 %v3470_v15 }
  0x73   :  { %2775 = vmatprep.subr.bf16.mxu0 %v3351_v0  ;;  %2799 = vmatprep.subr.bf16.mxu1 %v3351_v0 }
  0x74   :  { %2068 = vmatprep.mubr.f32.mxu0 %v83_v54  ;;  %v853_v54 = vld [vmem:[#allocation6 + $0xe8] sm:$0xff] }
  0x75   :  { %2069 = vmatmul.mubr.f32.gmra.mrb[4].mxu0 %v84_v55  ;;  %v2961_v55 = vpack.c.bf16 %v853_v54, %v852_v53 }
  0x76   :  { %2777 = vmatpush3.bf16.msra.mxu0 %v3474_v21  ;;  %2801 = vmatpush3.bf16.msra.mxu1 %v3474_v21 }
  0x77   :  { %2778 = vmatprep.subr.bf16.mxu0 %v3351_v0  ;;  %2802 = vmatprep.subr.bf16.mxu1 %v3351_v0 }
  0x78   :  { %2071 = vmatprep.mubr.f32.mxu0 %v85_v56  ;;  %v854_v56 = vld [vmem:[#allocation6 + $0xf0] sm:$0xff] }
  0x79   :  { %2072 = vmatmul.mubr.f32.gmra.mrb[6].mxu0 %v86_v57  ;;  %v855_v57 = vld [vmem:[#allocation6 + $0xf8] sm:$0xff] }
  0x7a   :  { %2780 = vmatpush3.bf16.msra.mxu0 %v3478_v28  ;;  %2804 = vmatpush3.bf16.msra.mxu1 %v3478_v28 }
  0x7b   :  { %2781 = vmatprep.subr.bf16.mxu0 %v3351_v0  ;;  %2805 = vmatprep.subr.bf16.mxu1 %v3351_v0 }
  0x7c   :  { %2141 = vmatprep.mubr.msk.f32.mxu0 %vm3352_vm0, %v3353_v1 }
  0x7e   :  { %2783 = vmatpush3.bf16.msra.mxu0 %v3482_v34  ;;  %2807 = vmatpush3.bf16.msra.mxu1 %v3482_v34 }
  0x7f   :  { %2784 = vmatprep.subr.bf16.mxu0 %v3351_v0  ;;  %2808 = vmatprep.subr.bf16.mxu1 %v3351_v0 }
  0x82   :  { %2786 = vmatpush3.bf16.msra.mxu0 %v3486_v40  ;;  %2810 = vmatpush3.bf16.msra.mxu1 %v3486_v40 }
  0x83   :  { %2787 = vmatprep.subr.bf16.mxu0 %v3351_v0  ;;  %2811 = vmatprep.subr.bf16.mxu1 %v3351_v0 }
  0x86   :  { %2789 = vmatpush3.bf16.msra.mxu0 %v3490_v46  ;;  %2813 = vmatpush3.bf16.msra.mxu1 %v3490_v46 }
  0x87   :  { %2790 = vmatprep.subr.bf16.mxu0 %v3351_v0  ;;  %2814 = vmatprep.subr.bf16.mxu1 %v3351_v0 }
  0x8a   :  { %2792 = vmatpush3.bf16.msra.mxu0 %v3494_v50  ;;  %2816 = vmatpush3.bf16.msra.mxu1 %v3494_v50 }
  0x8b   :  { %2817 = vmatprep.subr.bf16.mxu0 %v3351_v0  ;;  %2841 = vmatprep.subr.bf16.mxu1 %v3351_v0 }
 0x140   :  { %v2064_v59 = vpop.f32.mrb[0].mxu0  ;;  %v306_v60 = vpop.f32.mrb[0].mxu1 }
 0x141   :  { %v176_v61 = vpop.f32.mrb[1].mxu0  ;;  %v2108_v62 = vpop.f32.mrb[1].mxu1  ;;  %v182_v11 = vadd.f32 %v2064_v59, %v3540_v58  ;;  %v2965_v59 = vpack.c.bf16 %v855_v57, %v854_v56 }
 0x142   :  { %v177_v63 = vadd.f32 %v3540_v58, %v176_v61  ;;  %v979_v61 = vld [vmem:[#allocation8 + $0x88] sm:$0xff] }
 0x144   :  { %v310_v2 = vadd.f32 %v306_v60, %v177_v63  ;;  %v2067_v4 = vpop.f32.mrb[2].mxu0  ;;  %v978_v60 = vld [vmem:[#allocation8 + $0x80] sm:$0xff]  ;;  %v980_v63 = vld [vmem:[#allocation8 + $0x90] sm:$0xff] }
 0x145   :  { %v186_v5 = vpop.f32.mrb[3].mxu0  ;;  %v192_v23 = vadd.f32 %v2067_v4, %v3540_v58  ;;  %v3668_v62 = vpack.c.bf16 %v979_v61, %v978_v60  ;;  %v982_v4 = vld [vmem:[#allocation8 + $0xa0] sm:$0xff] }
 0x146   :  { %3195 = vtanh.f32 %v310_v2  ;;  %v187_v17 = vadd.f32 %v3540_v58, %v186_v5  ;;  %v981_v2 = vld [vmem:[#allocation8 + $0x98] sm:$0xff]  ;;  %v983_v5 = vld [vmem:[#allocation8 + $0xa8] sm:$0xff] }
 0x148   :  { %v3564_v6 = vpop.f32.mrb[4].mxu0 }
 0x149   :  { %v3566_v7 = vpop.f32.mrb[5].mxu0 }
 0x14a   :  { %v197_v29 = vadd.f32 %v3540_v58, %v3566_v7  ;;  %v984_v7 = vld [vmem:[#allocation8 + $0xb0] sm:$0xff] }
 0x14c   :  { %v3568_v8 = vpop.f32.mrb[6].mxu0 }
 0x14d   :  { %v3570_v10 = vpop.f32.mrb[7].mxu0 }
 0x150   :  { %v3543_v3 = vpop.eup %3195 }
 0x151   :  { %2142 = vmatmul.mubr.f32.vlgmr.msra.gmra.mrb[8].mxu0 %v3543_v3 }
 0x152   :  { %2819 = vmatpush3.bf16.msra.mxu0 %v3467_v9  ;;  %2211 = vmatprep.mubr.msk.f32.mxu0 %vm3352_vm0, %v3353_v1 }
 0x153   :  { %2820 = vmatprep.subr.bf16.mxu0 %v3351_v0 }
 0x156   :  { %2822 = vmatpush3.bf16.msra.mxu0 %v3470_v15 }
 0x157   :  { %2823 = vmatprep.subr.bf16.mxu0 %v3351_v0 }
 0x15a   :  { %2825 = vmatpush3.bf16.msra.mxu0 %v3474_v21 }
 0x15b   :  { %2826 = vmatprep.subr.bf16.mxu0 %v3351_v0 }
 0x15e   :  { %2828 = vmatpush3.bf16.msra.mxu0 %v3478_v28 }
 0x15f   :  { %2829 = vmatprep.subr.bf16.mxu0 %v3351_v0 }
 0x162   :  { %2831 = vmatpush3.bf16.msra.mxu0 %v3482_v34 }
 0x163   :  { %2832 = vmatprep.subr.bf16.mxu0 %v3351_v0 }
 0x166   :  { %2834 = vmatpush3.bf16.msra.mxu0 %v3486_v40 }
 0x167   :  { %2835 = vmatprep.subr.bf16.mxu0 %v3351_v0 }
 0x16a   :  { %2837 = vmatpush3.bf16.msra.mxu0 %v3490_v46 }
 0x16b   :  { %2838 = vmatprep.subr.bf16.mxu0 %v3351_v0 }
 0x16e   :  { %2840 = vmatpush3.bf16.msra.mxu0 %v3494_v50 }
 0x16f   :  { %2865 = vmatprep.subr.bf16.mxu0 %v3351_v0 }
 0x224   :  { %v380_v12 = vpop.f32.mrb[8].mxu0 }
 0x225   :  { %v384_v13 = vadd.f32 %v380_v12, %v182_v11  ;;  %v2143_v14 = vpop.f32.mrb[9].mxu0  ;;  %v985_v11 = vld [vmem:[#allocation8 + $0xb8] sm:$0xff] }
 0x226   :  { %v3680_v12 = vpack.c.bf16 %v985_v11, %v984_v7  ;;  %v987_v14 = vld [vmem:[#allocation8 + $0xc8] sm:$0xff] }
 0x227   :  { %3197 = vtanh.f32 %v384_v13  ;;  %v986_v13 = vld [vmem:[#allocation8 + $0xc0] sm:$0xff] }
 0x231   :  { %v3573_v16 = vpop.eup %3197 }
 0x232   :  { %2177 = vmatmul.mubr.f32.vlgmr.msra.gmra.mrb[2].mxu1 %v3573_v16 }
 0x233   :  { %2843 = vmatpush3.bf16.msra.mxu1 %v3467_v9  ;;  %2246 = vmatprep.mubr.msk.f32.mxu1 %vm3352_vm0, %v3353_v1 }
 0x234   :  { %2844 = vmatprep.subr.bf16.mxu1 %v3351_v0 }
 0x237   :  { %2846 = vmatpush3.bf16.msra.mxu1 %v3470_v15 }
 0x238   :  { %2847 = vmatprep.subr.bf16.mxu1 %v3351_v0 }
 0x23b   :  { %2849 = vmatpush3.bf16.msra.mxu1 %v3474_v21 }
 0x23c   :  { %2850 = vmatprep.subr.bf16.mxu1 %v3351_v0 }
 0x23f   :  { %2852 = vmatpush3.bf16.msra.mxu1 %v3478_v28 }
 0x240   :  { %2853 = vmatprep.subr.bf16.mxu1 %v3351_v0 }
 0x243   :  { %2855 = vmatpush3.bf16.msra.mxu1 %v3482_v34 }
 0x244   :  { %2856 = vmatprep.subr.bf16.mxu1 %v3351_v0 }
 0x247   :  { %2858 = vmatpush3.bf16.msra.mxu1 %v3486_v40 }
 0x248   :  { %2859 = vmatprep.subr.bf16.mxu1 %v3351_v0 }
 0x24b   :  { %2861 = vmatpush3.bf16.msra.mxu1 %v3490_v46 }
 0x24c   :  { %2862 = vmatprep.subr.bf16.mxu1 %v3351_v0 }
 0x24f   :  { %2864 = vmatpush3.bf16.msra.mxu1 %v3494_v50 }
 0x250   :  { %2889 = vmatprep.subr.bf16.mxu1 %v3351_v0 }
 0x305   :  { %v454_v18 = vpop.f32.mrb[2].mxu1 }
 0x306   :  { %v458_v19 = vadd.f32 %v454_v18, %v187_v17  ;;  %v2178_v20 = vpop.f32.mrb[3].mxu1  ;;  %v988_v17 = vld [vmem:[#allocation8 + $0xd0] sm:$0xff]  ;;  %v989_v18 = vld [vmem:[#allocation8 + $0xd8] sm:$0xff] }
 0x307   :  { %v990_v20 = vld [vmem:[#allocation8 + $0xe0] sm:$0xff] }
 0x308   :  { %3199 = vtanh.f32 %v458_v19  ;;  %v3688_v19 = vpack.c.bf16 %v989_v18, %v988_v17  ;;  %v1581_v17 = vld [vmem:[#allocation9 + $0x18] sm:$0xff] }
 0x312   :  { %v3595_v22 = vpop.eup %3199 }
 0x313   :  { %2212 = vmatmul.mubr.f32.vlgmr.msra.gmra.mrb[10].mxu0 %v3595_v22 }
 0x314   :  { %2867 = vmatpush3.bf16.msra.mxu0 %v3467_v9  ;;  %2281 = vmatprep.mubr.msk.f32.mxu0 %vm3352_vm0, %v3353_v1 }
 0x315   :  { %2868 = vmatprep.subr.bf16.mxu0 %v3351_v0 }
 0x318   :  { %2870 = vmatpush3.bf16.msra.mxu0 %v3470_v15 }
 0x319   :  { %2871 = vmatprep.subr.bf16.mxu0 %v3351_v0 }
 0x31c   :  { %2873 = vmatpush3.bf16.msra.mxu0 %v3474_v21 }
 0x31d   :  { %2874 = vmatprep.subr.bf16.mxu0 %v3351_v0 }
 0x320   :  { %2876 = vmatpush3.bf16.msra.mxu0 %v3478_v28 }
 0x321   :  { %2877 = vmatprep.subr.bf16.mxu0 %v3351_v0 }
 0x324   :  { %2879 = vmatpush3.bf16.msra.mxu0 %v3482_v34 }
 0x325   :  { %2880 = vmatprep.subr.bf16.mxu0 %v3351_v0 }
 0x328   :  { %2882 = vmatpush3.bf16.msra.mxu0 %v3486_v40 }
 0x329   :  { %2883 = vmatprep.subr.bf16.mxu0 %v3351_v0 }
 0x32c   :  { %2885 = vmatpush3.bf16.msra.mxu0 %v3490_v46 }
 0x32d   :  { %2886 = vmatprep.subr.bf16.mxu0 %v3351_v0 }
 0x330   :  { %2888 = vmatpush3.bf16.msra.mxu0 %v3494_v50 }
 0x331   :  { %2913 = vmatprep.subr.bf16.mxu0 %v3351_v0 }
 0x3e6   :  { %v528_v24 = vpop.f32.mrb[10].mxu0 }
 0x3e7   :  { %v532_v25 = vadd.f32 %v528_v24, %v192_v23  ;;  %v2213_v26 = vpop.f32.mrb[11].mxu0  ;;  %v992_v24 = vld [vmem:[#allocation8 + $0xf0] sm:$0xff] }
 0x3e9   :  { %3201 = vtanh.f32 %v532_v25  ;;  %v993_v25 = vld [vmem:[#allocation8 + $0xf8] sm:$0xff] }
 0x3ea   :  { %v3696_v26 = vpack.c.bf16 %v993_v25, %v992_v24  ;;  %v1585_v24 = vld [vmem:[#allocation9 + $0x38] sm:$0xff] }
 0x3f3   :  { %v3617_v27 = vpop.eup %3201 }
 0x3f4   :  { %2247 = vmatmul.mubr.f32.vlgmr.msra.gmra.mrb[4].mxu1 %v3617_v27 }
 0x3f5   :  { %2891 = vmatpush3.bf16.msra.mxu1 %v3467_v9  ;;  %2316 = vmatprep.mubr.msk.f32.mxu1 %vm3352_vm0, %v3353_v1 }
 0x3f6   :  { %2892 = vmatprep.subr.bf16.mxu1 %v3351_v0 }
 0x3f9   :  { %2894 = vmatpush3.bf16.msra.mxu1 %v3470_v15 }
 0x3fa   :  { %2895 = vmatprep.subr.bf16.mxu1 %v3351_v0 }
 0x3fd   :  { %2897 = vmatpush3.bf16.msra.mxu1 %v3474_v21 }
 0x3fe   :  { %2898 = vmatprep.subr.bf16.mxu1 %v3351_v0 }
 0x401   :  { %2900 = vmatpush3.bf16.msra.mxu1 %v3478_v28 }
 0x402   :  { %2901 = vmatprep.subr.bf16.mxu1 %v3351_v0 }
 0x405   :  { %2903 = vmatpush3.bf16.msra.mxu1 %v3482_v34 }
 0x406   :  { %2904 = vmatprep.subr.bf16.mxu1 %v3351_v0 }
 0x409   :  { %2906 = vmatpush3.bf16.msra.mxu1 %v3486_v40 }
 0x40a   :  { %2907 = vmatprep.subr.bf16.mxu1 %v3351_v0 }
 0x40d   :  { %2909 = vmatpush3.bf16.msra.mxu1 %v3490_v46 }
 0x40e   :  { %2910 = vmatprep.subr.bf16.mxu1 %v3351_v0 }
 0x411   :  { %2912 = vmatpush3.bf16.msra.mxu1 %v3494_v50 }
 0x4c7   :  { %v602_v30 = vpop.f32.mrb[4].mxu1 }
 0x4c8   :  { %v606_v31 = vadd.f32 %v602_v30, %v197_v29  ;;  %v2248_v32 = vpop.f32.mrb[5].mxu1 }
 0x4ca   :  { %3203 = vtanh.f32 %v606_v31 }
 0x4d4   :  { %v3639_v33 = vpop.eup %3203 }
 0x4d5   :  { %2282 = vmatmul.mubr.f32.vlgmr.msra.gmra.mrb[12].mxu0 %v3639_v33 }
 0x4d6   :  { %2915 = vmatpush3.bf16.msra.mxu0 %v3467_v9  ;;  %2351 = vmatprep.mubr.msk.f32.mxu0 %vm3352_vm0, %v3353_v1  ;;  %v840_v9 = vld [vmem:[#allocation6 + $0x80] sm:$0xff] }
 0x4d7   :  { %2916 = vmatprep.subr.bf16.mxu0 %v3351_v0 }
 0x4da   :  { %2918 = vmatpush3.bf16.msra.mxu0 %v3470_v15  ;;  %v841_v15 = vld [vmem:[#allocation6 + $0x88] sm:$0xff] }
 0x4db   :  { %2919 = vmatprep.subr.bf16.mxu0 %v3351_v0 }
 0x4de   :  { %2921 = vmatpush3.bf16.msra.mxu0 %v3474_v21  ;;  %v2937_v21 = vpack.c.bf16 %v841_v15, %v840_v9 }
 0x4df   :  { %2922 = vmatprep.subr.bf16.mxu0 %v3351_v0 }
 0x4e0   :  { %2938 = vmatprep.subr.bf16.mxu1 %v2937_v21 }
 0x4e2   :  { %2924 = vmatpush3.bf16.msra.mxu0 %v3478_v28  ;;  %v202_v28 = vadd.f32 %v3564_v6, %v3540_v58  ;;  %v3676_v6 = vpack.c.bf16 %v983_v5, %v982_v4 }
 0x4e3   :  { %2925 = vmatprep.subr.bf16.mxu0 %v3351_v0 }
 0x4e6   :  { %2927 = vmatpush3.bf16.msra.mxu0 %v3482_v34 }
 0x4e7   :  { %2928 = vmatprep.subr.bf16.mxu0 %v3351_v0 }
 0x4ea   :  { %2930 = vmatpush3.bf16.msra.mxu0 %v3486_v40 }
 0x4eb   :  { %2931 = vmatprep.subr.bf16.mxu0 %v3351_v0 }
 0x4ee   :  { %2933 = vmatpush3.bf16.msra.mxu0 %v3490_v46  ;;  %v2949_v46 = vpack.c.bf16 %v847_v45, %v846_v44 }
 0x4ef   :  { %2934 = vmatprep.subr.bf16.mxu0 %v3351_v0 }
 0x4f2   :  { %2936 = vmatpush3.bf16.msra.mxu0 %v3494_v50  ;;  %v850_v50 = vld [vmem:[#allocation6 + $0xd0] sm:$0xff] }
 0x4f3   :  { %2969 = vmatprep.subr.bf16.mxu0 %v3351_v0  ;;  %v2957_v52 = vpack.c.bf16 %v851_v51, %v850_v50 }
 0x5a8   :  { %v676_v34 = vpop.f32.mrb[12].mxu0 }
 0x5a9   :  { %v680_v35 = vadd.f32 %v676_v34, %v202_v28  ;;  %v2283_v36 = vpop.f32.mrb[13].mxu0  ;;  %v212_v34 = vadd.f32 %v3568_v8, %v3540_v58 }
 0x5ab   :  { %3205 = vtanh.f32 %v680_v35 }
 0x5b5   :  { %v3206_v40 = vpop.eup %3205 }
 0x5b6   :  { %2317 = vmatmul.mubr.f32.vlgmr.msra.gmra.mrb[6].mxu1 %v3206_v40 }
 0x5b7   :  { %2940 = vmatpush3.bf16.msra.mxu1 %v2937_v21  ;;  %2386 = vmatprep.mubr.f32.mxu1 %v3543_v3  ;;  %v3672_v3 = vpack.c.bf16 %v981_v2, %v980_v63 }
 0x5b8   :  { %2942 = vmatprep.subr.bf16.mxu1 %v2941_v39 }
 0x5bb   :  { %2944 = vmatpush3.bf16.msra.mxu1 %v2941_v39  ;;  %v3756_v39 = vld [vmem:[%s3893_s3 + $0x1] ss:$0 sm:$0xff] }
 0x5bc   :  { %2946 = vmatprep.subr.bf16.mxu1 %v2945_v43 }
 0x5bf   :  { %2948 = vmatpush3.bf16.msra.mxu1 %v2945_v43 }
 0x5c0   :  { %2950 = vmatprep.subr.bf16.mxu1 %v2949_v46 }
 0x5c3   :  { %2952 = vmatpush3.bf16.msra.mxu1 %v2949_v46 }
 0x5c4   :  { %2954 = vmatprep.subr.bf16.mxu1 %v2953_v49 }
 0x5c7   :  { %2956 = vmatpush3.bf16.msra.mxu1 %v2953_v49 }
 0x5c8   :  { %2958 = vmatprep.subr.bf16.mxu1 %v2957_v52 }
 0x5cb   :  { %2960 = vmatpush3.bf16.msra.mxu1 %v2957_v52 }
 0x5cc   :  { %2962 = vmatprep.subr.bf16.mxu1 %v2961_v55 }
 0x5cf   :  { %2964 = vmatpush3.bf16.msra.mxu1 %v2961_v55 }
 0x5d0   :  { %2966 = vmatprep.subr.bf16.mxu1 %v2965_v59 }
 0x5d3   :  { %2968 = vmatpush3.bf16.msra.mxu1 %v2965_v59 }
 0x5d4   :  { %2993 = vmatprep.subr.bf16.mxu1 %v3351_v0 }
 0x5d6   :  { %2387 = vmatmul.mubr.f32.vlgmr.msra.gmra.mrb[8].mxu1 %v3573_v16  ;;  %v3684_v16 = vpack.c.bf16 %v987_v14, %v986_v13  ;;  %v1579_v13 = vld [vmem:[#allocation9 + $0x8] sm:$0xff]  ;;  %v1580_v14 = vld [vmem:[#allocation9 + $0x10] sm:$0xff] }
 0x5d7   :  { %2389 = vmatprep.mubr.f32.mxu1 %v3595_v22  ;;  %2995 = vmatpush3.bf16.msra.mxu1 %v3668_v62  ;;  %v991_v22 = vld [vmem:[#allocation8 + $0xe8] sm:$0xff]  ;;  %v3165_v18 = vpack.c.bf16 %v1581_v17, %v1580_v14 }
 0x5d8   :  { %2996 = vmatprep.subr.bf16.mxu1 %v3351_v0  ;;  %v3692_v23 = vpack.c.bf16 %v991_v22, %v990_v20  ;;  %v1583_v20 = vld [vmem:[#allocation9 + $0x28] sm:$0xff] }
 0x5da   :  { %2390 = vmatmul.mubr.f32.gmra.mrb[10].mxu1 %v3617_v27  ;;  %v207_v27 = vadd.f32 %v3540_v58, %v3570_v10 }
 0x5db   :  { %2392 = vmatprep.mubr.f32.mxu1 %v3639_v33  ;;  %2998 = vmatpush3.bf16.msra.mxu1 %v3672_v3 }
 0x5dc   :  { %2999 = vmatprep.subr.bf16.mxu1 %v3351_v0 }
 0x5de   :  { %2393 = vmatmul.mubr.f32.gmra.mrb[12].mxu1 %v3206_v40 }
 0x5df   :  { %3001 = vmatpush3.bf16.msra.mxu1 %v3676_v6 }
 0x5e0   :  { %3002 = vmatprep.subr.bf16.mxu1 %v3351_v0 }
 0x5e3   :  { %3004 = vmatpush3.bf16.msra.mxu1 %v3680_v12 }
 0x5e4   :  { %3005 = vmatprep.subr.bf16.mxu1 %v3351_v0 }
 0x5e7   :  { %3007 = vmatpush3.bf16.msra.mxu1 %v3684_v16 }
 0x5e8   :  { %3008 = vmatprep.subr.bf16.mxu1 %v3351_v0 }
 0x5eb   :  { %3010 = vmatpush3.bf16.msra.mxu1 %v3688_v19 }
 0x5ec   :  { %3011 = vmatprep.subr.bf16.mxu1 %v3351_v0 }
 0x5ef   :  { %3013 = vmatpush3.bf16.msra.mxu1 %v3692_v23 }
 0x5f0   :  { %3014 = vmatprep.subr.bf16.mxu1 %v3351_v0 }
 0x5f3   :  { %3016 = vmatpush3.bf16.msra.mxu1 %v3696_v26 }
 0x5f4   :  { %3041 = vmatprep.subr.bf16.mxu1 %v3351_v0 }
 0x689   :  { %v750_v29 = vpop.f32.mrb[6].mxu1 }
 0x68a   :  { %v754_v30 = vadd.f32 %v750_v29, %v207_v27  ;;  %v2318_v31 = vpop.f32.mrb[7].mxu1 }
 0x68c   :  { %3207 = vtanh.f32 %v754_v30 }
 0x696   :  { %v3208_v32 = vpop.eup %3207 }
 0x697   :  { %2352 = vmatmul.mubr.f32.vlgmr.msra.gmra.mrb[14].mxu0 %v3208_v32  ;;  %2395 = vmatprep.mubr.f32.mxu1 %v3208_v32 }
 0x698   :  { %2971 = vmatpush3.bf16.msra.mxu0 %v3668_v62  ;;  %2430 = vmatprep.mubr.msk.f32.mxu0 %vm3352_vm0, %v3353_v1 }
 0x699   :  { %2972 = vmatprep.subr.bf16.mxu0 %v3351_v0 }
 0x69c   :  { %2974 = vmatpush3.bf16.msra.mxu0 %v3672_v3 }
 0x69d   :  { %2975 = vmatprep.subr.bf16.mxu0 %v3351_v0 }
 0x6a0   :  { %2977 = vmatpush3.bf16.msra.mxu0 %v3676_v6 }
 0x6a1   :  { %2978 = vmatprep.subr.bf16.mxu0 %v3351_v0 }
 0x6a4   :  { %2980 = vmatpush3.bf16.msra.mxu0 %v3680_v12 }
 0x6a5   :  { %2981 = vmatprep.subr.bf16.mxu0 %v3351_v0 }
 0x6a8   :  { %2983 = vmatpush3.bf16.msra.mxu0 %v3684_v16 }
 0x6a9   :  { %v3713_v10 = vpop.f32.mrb[8].mxu1  ;;  %2984 = vmatprep.subr.bf16.mxu0 %v3351_v0 }
 0x6aa   :  { %v930_v33 = vpop.f32.mrb[9].mxu1  ;;  %v936_v45 = vadd.f32 %v3713_v10, %v3756_v39 }
 0x6ab   :  { %v931_v40 = vadd.f32 %v3756_v39, %v930_v33  ;;  %v1588_v33 = vld [vmem:[#allocation9 + $0x50] sm:$0xff] }
 0x6ac   :  { %2986 = vmatpush3.bf16.msra.mxu0 %v3688_v19 }
 0x6ad   :  { %v3717_v9 = vpop.f32.mrb[10].mxu1  ;;  %2987 = vmatprep.subr.bf16.mxu0 %v3351_v0 }
 0x6ae   :  { %v3720_v15 = vpop.f32.mrb[11].mxu1  ;;  %v946_v55 = vadd.f32 %v3717_v9, %v3756_v39  ;;  %v1589_v9 = vld [vmem:[#allocation9 + $0x58] sm:$0xff] }
 0x6af   :  { %v941_v50 = vadd.f32 %v3756_v39, %v3720_v15  ;;  %v3177_v15 = vpack.c.bf16 %v1589_v9, %v1588_v33 }
 0x6b0   :  { %2989 = vmatpush3.bf16.msra.mxu0 %v3692_v23 }
 0x6b1   :  { %v3723_v21 = vpop.f32.mrb[12].mxu1  ;;  %2990 = vmatprep.subr.bf16.mxu0 %v3351_v0 }
 0x6b2   :  { %v3726_v28 = vpop.f32.mrb[13].mxu1 }
 0x6b3   :  { %v951_v61 = vadd.f32 %v3756_v39, %v3726_v28  ;;  %v1591_v28 = vld [vmem:[#allocation9 + $0x68] sm:$0xff] }
 0x6b4   :  { %2992 = vmatpush3.bf16.msra.mxu0 %v3696_v26 }
 0x6b5   :  { %3017 = vmatprep.subr.bf16.mxu0 %v3351_v0 }
 0x6b7   :  { %2431 = vmatmul.mubr.f32.vlgmr.msra.gmra.mrb[16].mxu0 %v3353_v1 }
 0x6b8   :  { %3019 = vmatpush3.bf16.msra.mxu0 %v3668_v62  ;;  %2500 = vmatprep.mubr.msk.f32.mxu0 %vm3352_vm0, %v3353_v1 }
 0x6b9   :  { %3020 = vmatprep.subr.bf16.mxu0 %v3351_v0 }
 0x6bc   :  { %3022 = vmatpush3.bf16.msra.mxu0 %v3672_v3 }
 0x6bd   :  { %3023 = vmatprep.subr.bf16.mxu0 %v3351_v0 }
 0x6c0   :  { %3025 = vmatpush3.bf16.msra.mxu0 %v3676_v6 }
 0x6c1   :  { %3026 = vmatprep.subr.bf16.mxu0 %v3351_v0 }
 0x6c4   :  { %3028 = vmatpush3.bf16.msra.mxu0 %v3680_v12 }
 0x6c5   :  { %3029 = vmatprep.subr.bf16.mxu0 %v3351_v0 }
 0x6c8   :  { %3031 = vmatpush3.bf16.msra.mxu0 %v3684_v16 }
 0x6c9   :  { %3032 = vmatprep.subr.bf16.mxu0 %v3351_v0 }
 0x6cc   :  { %3034 = vmatpush3.bf16.msra.mxu0 %v3688_v19 }
 0x6cd   :  { %3035 = vmatprep.subr.bf16.mxu0 %v3351_v0 }
 0x6d0   :  { %3037 = vmatpush3.bf16.msra.mxu0 %v3692_v23 }
 0x6d1   :  { %3038 = vmatprep.subr.bf16.mxu0 %v3351_v0 }
 0x6d4   :  { %3040 = vmatpush3.bf16.msra.mxu0 %v3696_v26 }
 0x6d5   :  { %3065 = vmatprep.subr.bf16.mxu0 %v3351_v0 }
 0x76a   :  { %v824_v35 = vpop.f32.mrb[14].mxu0 }
 0x76b   :  { %v828_v36 = vadd.f32 %v824_v35, %v212_v34  ;;  %v2353_v37 = vpop.f32.mrb[15].mxu0  ;;  %v1592_v35 = vld [vmem:[#allocation9 + $0x70] sm:$0xff] }
 0x76d   :  { %3209 = vtanh.f32 %v828_v36  ;;  %v1593_v36 = vld [vmem:[#allocation9 + $0x78] sm:$0xff] }
 0x76e   :  { %v3183_v37 = vpack.c.bf16 %v1593_v36, %v1592_v35 }
 0x777   :  { %v3210_v38 = vpop.eup %3209 }
 0x778   :  { %2396 = vmatmul.mubr.f32.gmra.mrb[14].mxu1 %v3210_v38 }
 0x779   :  { %2465 = vmatprep.mubr.msk.f32.mxu1 %vm3352_vm0, %v3353_v1 }
 0x78a   :  { %v1061_v41 = vpop.f32.mrb[16].mxu0 }
 0x78b   :  { %v1065_v42 = vadd.f32 %v1061_v41, %v931_v40  ;;  %v2432_v43 = vpop.f32.mrb[17].mxu0 }
 0x78d   :  { %3211 = vtanh.f32 %v1065_v42 }
 0x797   :  { %v3212_v58 = vpop.eup %3211 }
 0x798   :  { %2466 = vmatmul.mubr.f32.vlgmr.msra.gmra.mrb[16].mxu1 %v3212_v58  ;;  %v1692_v58 = vld [vmem:[%s3895_s5] ss:$0 sm:$0xff] }
 0x799   :  { %3043 = vmatpush3.bf16.msra.mxu1 %v3668_v62  ;;  %2535 = vmatprep.mubr.msk.f32.mxu1 %vm3352_vm0, %v3353_v1 }
 0x79a   :  { %3044 = vmatprep.subr.bf16.mxu1 %v3351_v0 }
 0x79d   :  { %3046 = vmatpush3.bf16.msra.mxu1 %v3672_v3 }
 0x79e   :  { %3047 = vmatprep.subr.bf16.mxu1 %v3351_v0 }
 0x7a1   :  { %3049 = vmatpush3.bf16.msra.mxu1 %v3676_v6 }
 0x7a2   :  { %3050 = vmatprep.subr.bf16.mxu1 %v3351_v0 }
 0x7a5   :  { %3052 = vmatpush3.bf16.msra.mxu1 %v3680_v12 }
 0x7a6   :  { %3053 = vmatprep.subr.bf16.mxu1 %v3351_v0 }
 0x7a9   :  { %3055 = vmatpush3.bf16.msra.mxu1 %v3684_v16 }
 0x7aa   :  { %3056 = vmatprep.subr.bf16.mxu1 %v3351_v0 }
 0x7ad   :  { %3058 = vmatpush3.bf16.msra.mxu1 %v3688_v19 }
 0x7ae   :  { %3059 = vmatprep.subr.bf16.mxu1 %v3351_v0 }
 0x7b1   :  { %3061 = vmatpush3.bf16.msra.mxu1 %v3692_v23 }
 0x7b2   :  { %3062 = vmatprep.subr.bf16.mxu1 %v3351_v0 }
 0x7b5   :  { %3064 = vmatpush3.bf16.msra.mxu1 %v3696_v26 }
 0x7b6   :  { %3089 = vmatprep.subr.bf16.mxu1 %v3351_v0 }
 0x84b   :  { %v3777_v8 = vpop.f32.mrb[14].mxu1 }
 0x84c   :  { %v3779_v44 = vpop.f32.mrb[15].mxu1  ;;  %v966_v38 = vadd.f32 %v3777_v8, %v3756_v39 }
 0x84d   :  { %v961_v29 = vadd.f32 %v3756_v39, %v3779_v44 }
 0x86b   :  { %v1134_v46 = vpop.f32.mrb[16].mxu1 }
 0x86c   :  { %v1138_v47 = vadd.f32 %v1134_v46, %v936_v45  ;;  %v2467_v48 = vpop.f32.mrb[17].mxu1 }
 0x86e   :  { %3213 = vtanh.f32 %v1138_v47 }
 0x878   :  { %v3214_v49 = vpop.eup %3213 }
 0x879   :  { %2501 = vmatmul.mubr.f32.vlgmr.msra.gmra.mrb[18].mxu0 %v3214_v49 }
 0x87a   :  { %3067 = vmatpush3.bf16.msra.mxu0 %v3668_v62  ;;  %2570 = vmatprep.mubr.msk.f32.mxu0 %vm3352_vm0, %v3353_v1 }
 0x87b   :  { %3068 = vmatprep.subr.bf16.mxu0 %v3351_v0 }
 0x87e   :  { %3070 = vmatpush3.bf16.msra.mxu0 %v3672_v3 }
 0x87f   :  { %3071 = vmatprep.subr.bf16.mxu0 %v3351_v0 }
 0x882   :  { %3073 = vmatpush3.bf16.msra.mxu0 %v3676_v6 }
 0x883   :  { %3074 = vmatprep.subr.bf16.mxu0 %v3351_v0 }
 0x886   :  { %3076 = vmatpush3.bf16.msra.mxu0 %v3680_v12 }
 0x887   :  { %3077 = vmatprep.subr.bf16.mxu0 %v3351_v0 }
 0x88a   :  { %3079 = vmatpush3.bf16.msra.mxu0 %v3684_v16 }
 0x88b   :  { %3080 = vmatprep.subr.bf16.mxu0 %v3351_v0 }
 0x88e   :  { %3082 = vmatpush3.bf16.msra.mxu0 %v3688_v19 }
 0x88f   :  { %3083 = vmatprep.subr.bf16.mxu0 %v3351_v0 }
 0x892   :  { %3085 = vmatpush3.bf16.msra.mxu0 %v3692_v23 }
 0x893   :  { %3086 = vmatprep.subr.bf16.mxu0 %v3351_v0 }
 0x896   :  { %3088 = vmatpush3.bf16.msra.mxu0 %v3696_v26 }
 0x897   :  { %3113 = vmatprep.subr.bf16.mxu0 %v3351_v0 }
 0x94c   :  { %v1207_v51 = vpop.f32.mrb[18].mxu0 }
 0x94d   :  { %v1211_v52 = vadd.f32 %v1207_v51, %v941_v50  ;;  %v2502_v53 = vpop.f32.mrb[19].mxu0 }
 0x94f   :  { %3215 = vtanh.f32 %v1211_v52 }
 0x959   :  { %v3216_v54 = vpop.eup %3215 }
 0x95a   :  { %2536 = vmatmul.mubr.f32.vlgmr.msra.gmra.mrb[18].mxu1 %v3216_v54 }
 0x95b   :  { %3091 = vmatpush3.bf16.msra.mxu1 %v3668_v62  ;;  %2605 = vmatprep.mubr.msk.f32.mxu1 %vm3352_vm0, %v3353_v1 }
 0x95c   :  { %3092 = vmatprep.subr.bf16.mxu1 %v3351_v0 }
 0x95f   :  { %3094 = vmatpush3.bf16.msra.mxu1 %v3672_v3 }
 0x960   :  { %3095 = vmatprep.subr.bf16.mxu1 %v3351_v0 }
 0x963   :  { %3097 = vmatpush3.bf16.msra.mxu1 %v3676_v6 }
 0x964   :  { %3098 = vmatprep.subr.bf16.mxu1 %v3351_v0 }
 0x967   :  { %3100 = vmatpush3.bf16.msra.mxu1 %v3680_v12 }
 0x968   :  { %3101 = vmatprep.subr.bf16.mxu1 %v3351_v0 }
 0x96b   :  { %3103 = vmatpush3.bf16.msra.mxu1 %v3684_v16 }
 0x96c   :  { %3104 = vmatprep.subr.bf16.mxu1 %v3351_v0 }
 0x96f   :  { %3106 = vmatpush3.bf16.msra.mxu1 %v3688_v19 }
 0x970   :  { %3107 = vmatprep.subr.bf16.mxu1 %v3351_v0 }
 0x973   :  { %3109 = vmatpush3.bf16.msra.mxu1 %v3692_v23 }
 0x974   :  { %3110 = vmatprep.subr.bf16.mxu1 %v3351_v0 }
 0x977   :  { %3112 = vmatpush3.bf16.msra.mxu1 %v3696_v26 }
 0x978   :  { %3137 = vmatprep.subr.bf16.mxu1 %v3351_v0 }
 0xa2d   :  { %v1280_v56 = vpop.f32.mrb[18].mxu1 }
 0xa2e   :  { %v1284_v57 = vadd.f32 %v1280_v56, %v946_v55  ;;  %v2537_v59 = vpop.f32.mrb[19].mxu1 }
 0xa30   :  { %3217 = vtanh.f32 %v1284_v57 }
 0xa3a   :  { %v3218_v60 = vpop.eup %3217 }
 0xa3b   :  { %2571 = vmatmul.mubr.f32.vlgmr.msra.gmra.mrb[20].mxu0 %v3218_v60 }
 0xa3c   :  { %3115 = vmatpush3.bf16.msra.mxu0 %v3668_v62  ;;  %2640 = vmatprep.mubr.msk.f32.mxu0 %vm3352_vm0, %v3353_v1 }
 0xa3d   :  { %3116 = vmatprep.subr.bf16.mxu0 %v3351_v0 }
 0xa40   :  { %3118 = vmatpush3.bf16.msra.mxu0 %v3672_v3 }
 0xa41   :  { %3119 = vmatprep.subr.bf16.mxu0 %v3351_v0 }
 0xa44   :  { %3121 = vmatpush3.bf16.msra.mxu0 %v3676_v6 }
 0xa45   :  { %3122 = vmatprep.subr.bf16.mxu0 %v3351_v0 }
 0xa48   :  { %3124 = vmatpush3.bf16.msra.mxu0 %v3680_v12 }
 0xa49   :  { %3125 = vmatprep.subr.bf16.mxu0 %v3351_v0 }
 0xa4c   :  { %3127 = vmatpush3.bf16.msra.mxu0 %v3684_v16 }
 0xa4d   :  { %3128 = vmatprep.subr.bf16.mxu0 %v3351_v0 }
 0xa50   :  { %3130 = vmatpush3.bf16.msra.mxu0 %v3688_v19 }
 0xa51   :  { %3131 = vmatprep.subr.bf16.mxu0 %v3351_v0 }
 0xa54   :  { %3133 = vmatpush3.bf16.msra.mxu0 %v3692_v23 }
 0xa55   :  { %3134 = vmatprep.subr.bf16.mxu0 %v3351_v0 }
 0xa58   :  { %3136 = vmatpush3.bf16.msra.mxu0 %v3696_v26 }
 0xa59   :  { %3161 = vmatprep.subr.bf16.mxu0 %v3351_v0 }
 0xb0e   :  { %v1353_v63 = vpop.f32.mrb[20].mxu0 }
 0xb0f   :  { %v1357_v2 = vadd.f32 %v1353_v63, %v951_v61  ;;  %v2572_v4 = vpop.f32.mrb[21].mxu0 }
 0xb11   :  { %3219 = vtanh.f32 %v1357_v2 }
 0xb1b   :  { %v3220_v5 = vpop.eup %3219 }
 0xb1c   :  { %2606 = vmatmul.mubr.f32.vlgmr.msra.gmra.mrb[20].mxu1 %v3220_v5 }
 0xb1d   :  { %3139 = vmatpush3.bf16.msra.mxu1 %v3668_v62  ;;  %2675 = vmatprep.mubr.msk.f32.mxu1 %vm3352_vm0, %v3353_v1  ;;  %v956_v62 = vadd.f32 %v3723_v21, %v3756_v39  ;;  %v1590_v21 = vld [vmem:[#allocation9 + $0x60] sm:$0xff] }
 0xb1e   :  { %3140 = vmatprep.subr.bf16.mxu1 %v3351_v0  ;;  %v3180_v34 = vpack.c.bf16 %v1591_v28, %v1590_v21 }
 0xb21   :  { %3142 = vmatpush3.bf16.msra.mxu1 %v3672_v3 }
 0xb22   :  { %3143 = vmatprep.subr.bf16.mxu1 %v3351_v0 }
 0xb25   :  { %3145 = vmatpush3.bf16.msra.mxu1 %v3676_v6 }
 0xb26   :  { %3146 = vmatprep.subr.bf16.mxu1 %v3351_v0 }
 0xb29   :  { %3148 = vmatpush3.bf16.msra.mxu1 %v3680_v12  ;;  %v1578_v12 = vld [vmem:[#allocation9] sm:$0xff] }
 0xb2a   :  { %3149 = vmatprep.subr.bf16.mxu1 %v3351_v0 }
 0xb2d   :  { %3151 = vmatpush3.bf16.msra.mxu1 %v3684_v16  ;;  %v3162_v16 = vpack.c.bf16 %v1579_v13, %v1578_v12 }
 0xb2e   :  { %3152 = vmatprep.subr.bf16.mxu1 %v3351_v0 }
 0xb31   :  { %3154 = vmatpush3.bf16.msra.mxu1 %v3688_v19  ;;  %v1582_v19 = vld [vmem:[#allocation9 + $0x20] sm:$0xff] }
 0xb32   :  { %3155 = vmatprep.subr.bf16.mxu1 %v3351_v0  ;;  %v3168_v22 = vpack.c.bf16 %v1583_v20, %v1582_v19 }
 0xb35   :  { %3157 = vmatpush3.bf16.msra.mxu1 %v3692_v23  ;;  %v1584_v23 = vld [vmem:[#allocation9 + $0x30] sm:$0xff] }
 0xb36   :  { %3158 = vmatprep.subr.bf16.mxu1 %v3351_v0  ;;  %v3171_v25 = vpack.c.bf16 %v1585_v24, %v1584_v23 }
 0xb39   :  { %3160 = vmatpush3.bf16.msra.mxu1 %v3696_v26  ;;  %v1587_v26 = vld [vmem:[#allocation9 + $0x48] sm:$0xff] }
 0xbef   :  { %v1426_v3 = vpop.f32.mrb[20].mxu1 }
 0xbf0   :  { %v1430_v6 = vadd.f32 %v1426_v3, %v956_v62  ;;  %v2607_v7 = vpop.f32.mrb[21].mxu1 }
 0xbf2   :  { %3221 = vtanh.f32 %v1430_v6 }
 0xbfc   :  { %v3222_v11 = vpop.eup %3221 }
 0xbfd   :  { %2641 = vmatmul.mubr.f32.vlgmr.msra.gmra.mrb[22].mxu0 %v3222_v11 }
 0xbfe   :  { %2710 = vmatprep.mubr.msk.f32.mxu0 %vm3352_vm0, %v3353_v1  ;;  %3163 = vmatpush3.bf16.msra.mxu0 %v3162_v16  ;;  %v1586_v1 = vld [vmem:[#allocation9 + $0x40] sm:$0xff] }
 0xbff   :  { %3164 = vmatprep.subr.bf16.mxu0 %v3351_v0  ;;  %v3174_v27 = vpack.c.bf16 %v1587_v26, %v1586_v1 }
 0xc02   :  { %3166 = vmatpush3.bf16.msra.mxu0 %v3165_v18 }
 0xc03   :  { %3167 = vmatprep.subr.bf16.mxu0 %v3351_v0 }
 0xc06   :  { %3169 = vmatpush3.bf16.msra.mxu0 %v3168_v22 }
 0xc07   :  { %3170 = vmatprep.subr.bf16.mxu0 %v3351_v0 }
 0xc0a   :  { %3172 = vmatpush3.bf16.msra.mxu0 %v3171_v25 }
 0xc0b   :  { %3173 = vmatprep.subr.bf16.mxu0 %v3351_v0 }
 0xc0e   :  { %3175 = vmatpush3.bf16.msra.mxu0 %v3174_v27 }
 0xc0f   :  { %3176 = vmatprep.subr.bf16.mxu0 %v3351_v0 }
 0xc12   :  { %3178 = vmatpush3.bf16.msra.mxu0 %v3177_v15 }
 0xc13   :  { %3179 = vmatprep.subr.bf16.mxu0 %v3351_v0 }
 0xc16   :  { %3181 = vmatpush3.bf16.msra.mxu0 %v3180_v34 }
 0xc17   :  { %3182 = vmatprep.subr.bf16.mxu0 %v3351_v0 }
 0xc1a   :  { %3184 = vmatpush3.bf16.msra.mxu0 %v3183_v37 }
 0xcd0   :  { %v1499_v30 = vpop.f32.mrb[22].mxu0 }
 0xcd1   :  { %v1503_v31 = vadd.f32 %v1499_v30, %v961_v29  ;;  %v2642_v32 = vpop.f32.mrb[23].mxu0 }
 0xcd3   :  { %3223 = vtanh.f32 %v1503_v31 }
 0xcdd   :  { %v3224_v10 = vpop.eup %3223 }
 0xcde   :  { %2676 = vmatmul.mubr.f32.vlgmr.msra.gmra.mrb[22].mxu1 %v3224_v10 }
 0xdb1   :  { %v1572_v40 = vpop.f32.mrb[22].mxu1 }
 0xdb2   :  { %v1576_v41 = vadd.f32 %v1572_v40, %v966_v38  ;;  %v2677_v42 = vpop.f32.mrb[23].mxu1 }
 0xdb4   :  { %3225 = vtanh.f32 %v1576_v41 }
 0xdbe   :  { %v3226_v43 = vpop.eup %3225 }
 0xdbf   :  { %2711 = vmatmul.mubr.f32.vlgmr.msra.gmra.mrb[24].mxu0 %v3226_v43 }
 0xe92   :  { %v1667_v44 = vpop.f32.mrb[24].mxu0 }
 0xe93   :  { %v1668_v45 = vadd.f32 %v1692_v58, %v1667_v44  ;;  %v2712_v46 = vpop.f32.mrb[25].mxu0 }
 0xe95   :  { %1671 = vst [vmem:[#allocation11] sm:$0xff] %v1668_v45 }
 0xe96   :  { %3326 = shalt.err (!%p3323_p8)
}
 0xe97   :  { %s3327_s29 = scalar_lea.hbm %s3896_s6, 128 }
 0xe98   :  { %p3328_p9 = scmp.ne.s32.totalorder %s3896_s6, %s3327_s29  ;;  %p3331_p10 = scmp.lt.u32.totalorder %s3327_s29, %s3896_s6 }
 0xe9a   :  { %p3333_p11 = pnand %p3331_p10, %p3328_p9 }
 0xe9c   :  { %3336 = shalt.err (!%p3333_p11)
}
 0xe9d   :  { %1681 = dma.vmem_to_hbm [thread:$0]  %s1679_s25, 128, %s3896_s6, [#allocation5]  }
 0xe9e   :  { %3343 = dma.done.wait [#allocation5], 128  }
 0xe9f   :  { %3344 = vsyncadd [#allocation5], 4294967168 }
 0xea0   :  { %1685 = vsyncpa [#allocation4], 1 }
 0xea1   :  { %1686 = vsyncpa [#allocation7], 1 }
 0xea2   :  { %1687 = vsyncpa [#allocation10], 1 }
 0xea3   :  { %1688 = vsyncpa [#allocation5], 1 }

</bundles_post_ra>
